<compile_context>
chip_gen: v7x
topology: tpu7x:2x2x1
jax: 0.10.0
libtpu: 0.0.40
codegen_flags: <defaults>
</compile_context>

<pallas_src>
import math

import jax
import jax.numpy as jnp
import numpy as np
from jax.experimental import pallas as pl
from jax.experimental.pallas import tpu as pltpu


# ----------------------------------------------------------------------------
# small helpers
# ----------------------------------------------------------------------------
def _round_up(x, m):
    return (x + m - 1) // m * m


def _pick_tile(dim, prefs):
    for t in prefs:
        if dim % t == 0:
            return t
    return dim


def _pick_tm(m):
    """Pick the M tile that minimizes zero-padding waste (prefer larger tiles
    on ties).  For tiny M just round up to the 8-sublane granule."""
    if m <= 128:
        return _round_up(m, 8)
    best_t, best_pad = None, None
    for t in (512, 256, 128):
        pad = _round_up(m, t)
        if best_pad is None or pad < best_pad:
            best_t, best_pad = t, pad
    return best_t


def _pad2d(x, rows, cols):
    r, c = x.shape
    if r == rows and c == cols:
        return x
    return jnp.pad(x, ((0, rows - r), (0, cols - c)))


# ----------------------------------------------------------------------------
# Pallas kernel 1: tiled GEMM + bias  (the im2col contraction, MXU hot path)
# ----------------------------------------------------------------------------
def _matmul_bias_kernel(a_ref, w_ref, b_ref, o_ref, acc_ref):
    k = pl.program_id(2)

    @pl.when(k == 0)
    def _():
        acc_ref[...] = jnp.zeros_like(acc_ref)

    acc_ref[...] += jnp.dot(a_ref[...], w_ref[...],
                            preferred_element_type=jnp.float32)

    @pl.when(k == pl.num_programs(2) - 1)
    def _():
        o_ref[...] = (acc_ref[...] + b_ref[...]).astype(o_ref.dtype)


def pallas_matmul_bias(a, w_padded, b_row):
    """GEMM + bias on the MXU.

    a:        (M, K)  float32 im2col patches (unpadded)
    w_padded: (Kp, Np) bfloat16 weights, Kp % 128 == 0 >= K, Np % 128 == 0
    b_row:    (1, Np)  float32 bias row
    returns   (M, Np)  float32
    """
    M, K = a.shape
    Kp, Np = w_padded.shape
    assert Kp % 128 == 0 and Np % 128 == 0 and Kp >= K
    assert b_row.shape == (1, Np)

    # Tile sizes: sized so double-buffered bf16 blocks + f32 accumulator stay
    # well under the 32 MiB scoped-VMEM default (safe on v7x's 64 MiB VMEM,
    # also fine on v5e/v6e).
    tm = _pick_tm(M)
    tk = _pick_tile(Kp, (512, 256, 128))
    tn = _pick_tile(Np, (256, 128))
    Mp = _round_up(M, tm)

    a = jnp.pad(a.astype(jnp.bfloat16), ((0, Mp - M), (0, Kp - K)))

    grid = (Mp // tm, Np // tn, Kp // tk)
    cost = pl.CostEstimate(
        flops=2 * Mp * Np * Kp,
        transcendentals=0,
        bytes_accessed=Mp * Kp * 2 + Kp * Np * 2 + Np * 4 + Mp * Np * 4,
    )

    out = pl.pallas_call(
        _matmul_bias_kernel,
        out_shape=jax.ShapeDtypeStruct((Mp, Np), jnp.float32),
        grid_spec=pltpu.PrefetchScalarGridSpec(
            num_scalar_prefetch=0,
            grid=grid,
            in_specs=[
                pl.BlockSpec((tm, tk), lambda i, j, k: (i, k)),
                pl.BlockSpec((tk, tn), lambda i, j, k: (k, j)),
                pl.BlockSpec((1, tn), lambda i, j, k: (0, j)),
            ],
            out_specs=pl.BlockSpec((tm, tn), lambda i, j, k: (i, j)),
            scratch_shapes=[pltpu.VMEM((tm, tn), jnp.float32)],
        ),
        compiler_params=pltpu.CompilerParams(
            dimension_semantics=("parallel", "parallel", "arbitrary"),
            vmem_limit_bytes=32 * 1024 * 1024,
        ),
        cost_estimate=cost,
    )(a, w_padded, b_row)

    return out if Mp == M else out[:M]


# ----------------------------------------------------------------------------
# Pallas kernel 2: fused nearest-2x upsample + in-place add on GEMM slabs
# ----------------------------------------------------------------------------
def _upsample_add_kernel(h_ref, l_ref, o_ref):
    # h: (rt, 2, OWl, 2, C)  -- two output rows / two output cols per low pixel
    # l: (rt, 1, OWl, 1, C)
    l = l_ref[...]
    l = jnp.concatenate([l, l], axis=1)          # duplicate along H (untiled)
    o_ref[...] = h_ref[...] + l                  # sublane broadcast along W


def pallas_upsample2x_add(out_h_slab, lh_slab, n, ohl, owl):
    """out_h_slab: (n*2*ohl*2*owl, C), lh_slab: (n*ohl*owl, C); row order is
    (n, oh, ow) / (n, ohl, owl).  Returns out_h_slab + nearest_2x(lh_slab)."""
    cp = out_h_slab.shape[1]
    assert lh_slab.shape == (n * ohl * owl, cp)
    r = n * ohl
    a = out_h_slab.reshape(r, 2, owl, 2, cp)
    b = lh_slab.reshape(r, 1, owl, 1, cp)

    rt = 1
    for cand in (16, 8, 4, 2, 1):
        if r % cand == 0:
            rt = cand
            break

    out = pl.pallas_call(
        _upsample_add_kernel,
        out_shape=jax.ShapeDtypeStruct(a.shape, a.dtype),
        grid=(r // rt,),
        in_specs=[
            pl.BlockSpec((rt, 2, owl, 2, cp), lambda g: (g, 0, 0, 0, 0)),
            pl.BlockSpec((rt, 1, owl, 1, cp), lambda g: (g, 0, 0, 0, 0)),
        ],
        out_specs=pl.BlockSpec((rt, 2, owl, 2, cp), lambda g: (g, 0, 0, 0, 0)),
        input_output_aliases={0: 0},
        compiler_params=pltpu.CompilerParams(
            dimension_semantics=("parallel",)),
    )(a, b)
    return out.reshape(out_h_slab.shape)


# ----------------------------------------------------------------------------
# glue: NHWC im2col / pooling (plain JAX)
# ----------------------------------------------------------------------------
def _im2col_nhwc(x, kh, kw, stride, padding):
    """x: (N, H, W, C) -> patches (N*OH*OW, KH*KW*C), K order = (kh, kw, c)."""
    n, h, w, c = x.shape
    oh = (h + 2 * padding - kh) // stride + 1
    ow = (w + 2 * padding - kw) // stride + 1
    xp = jnp.pad(x, ((0, 0), (padding, padding), (padding, padding), (0, 0)))
    cols = []
    for i in range(kh):
        for j in range(kw):
            cols.append(
                xp[:, i:i + (oh - 1) * stride + 1:stride,
                      j:j + (ow - 1) * stride + 1:stride, :])
    patches = jnp.stack(cols, axis=3).reshape(n * oh * ow, kh * kw * c)
    return patches, oh, ow


def _avg_pool_2x2_nhwc(x):
    n, h, w, c = x.shape
    return x.reshape(n, h // 2, 2, w // 2, 2, c).mean(axis=(2, 4))


def _weight_to_mat(w):
    # (Cout, Cin, KH, KW) -> (KH*KW*Cin, Cout), rows ordered (kh, kw, cin)
    cout, cin, kh, kw = w.shape
    return w.transpose(2, 3, 1, 0).reshape(kh * kw * cin, cout)


# ----------------------------------------------------------------------------
# OctConv2d (Pallas)
# ----------------------------------------------------------------------------
class OctConv2dPallas:
    def __init__(self, in_channels, out_channels, kernel_size, alpha_in,
                 alpha_out, stride=1, padding=0, key=None):
        in_l = alpha_in * in_channels
        out_l = alpha_out * out_channels
        assert float(in_l).is_integer() and float(out_l).is_integer()
        in_l, out_l = int(in_l), int(out_l)
        assert in_l % 4 == 0 and out_l % 4 == 0
        in_h, out_h = in_channels - in_l, out_channels - out_l
        self.in_channels_l, self.in_channels_h = in_l, in_h
        self.out_channels_l, self.out_channels_h = out_l, out_h
        self.has_in_l = in_l > 0
        self.has_out_l = out_l > 0
        self.stride = stride
        self.padding = padding
        self.kernel_size = kernel_size
        KH, KW = kernel_size

        if key is None:
            key = jax.random.PRNGKey(0)
        keys = jax.random.split(key, 8)

        def make_conv_params(k_w, k_b, cout, cin):
            fan_in = cin * KH * KW
            bound = 1.0 / math.sqrt(fan_in)
            w = jax.random.uniform(k_w, (cout, cin, KH, KW), jnp.float32,
                                   -bound, bound)
            b = jax.random.uniform(k_b, (cout,), jnp.float32, -bound, bound)
            return w, b

        self.w_hh, self.b_hh = make_conv_params(keys[0], keys[1], out_h, in_h)
        if self.has_in_l and self.has_out_l:
            self.w_ll, self.b_ll = make_conv_params(keys[2], keys[3], out_l, in_l)
        if self.has_in_l:
            self.w_lh, self.b_lh = make_conv_params(keys[4], keys[5], out_h, in_l)
        if self.has_out_l:
            self.w_hl, self.b_hl = make_conv_params(keys[6], keys[7], out_l, in_h)

        self._prep_gemm_operands()
        self._jit_forward = jax.jit(self._forward)

    # -- one-time weight layout: (K, Cout) matrices, padded to 128, bf16 -----
    def _prep_gemm_operands(self):
        oh_c, ol_c = self.out_channels_h, self.out_channels_l

        # high-frequency branch: conv_hh
        m = _weight_to_mat(self.w_hh)
        k_h, n_h = m.shape
        kp, npad = _round_up(k_h, 128), _round_up(n_h, 128)
        self._w_hh_mat = _pad2d(m, kp, npad).astype(jnp.bfloat16)
        self._b_hh_row = _pad2d(self.b_hh.reshape(1, -1), 1, npad)
        self._np_h = npad

        if not (self.has_in_l or self.has_out_l):
            return

        # low-frequency branch, fused: A = [patches(pool(x_h)) | patches(x_l)]
        # W = [[0, w_hl], [w_lh, w_ll]] -> output columns [lh | out_l]
        if self.has_in_l and self.has_out_l:
            m_lh, m_hl, m_ll = (_weight_to_mat(self.w_lh),
                                _weight_to_mat(self.w_hl),
                                _weight_to_mat(self.w_ll))
            k_ph, k_l = m_hl.shape[0], m_lh.shape[0]
            top = jnp.concatenate(
                [jnp.zeros((k_ph, oh_c), jnp.float32), m_hl], axis=1)
            bot = jnp.concatenate([m_lh, m_ll], axis=1)
            w_low = jnp.concatenate([top, bot], axis=0)
            b_low = jnp.concatenate([self.b_lh, self.b_hl + self.b_ll])
            self._outl_col0 = oh_c
        elif self.has_in_l:
            w_low, b_low = _weight_to_mat(self.w_lh), self.b_lh
            self._outl_col0 = None
        else:  # only has_out_l
            w_low, b_low = _weight_to_mat(self.w_hl), self.b_hl
            self._outl_col0 = 0

        k_low, n_low = w_low.shape
        kp_low, np_low = _round_up(k_low, 128), _round_up(n_low, 128)
        self._w_low_mat = _pad2d(w_low, kp_low, np_low).astype(jnp.bfloat16)
        self._b_low_row = _pad2d(b_low.reshape(1, -1), 1, np_low)
        self._np_low = np_low

    # -- forward -------------------------------------------------------------
    def _forward(self, x_h, x_l):
        N = x_h.shape[0]
        KH, KW = self.kernel_size
        s, p = self.stride, self.padding

        xh_nhwc = jnp.transpose(x_h, (0, 2, 3, 1))

        # high-frequency branch: conv_hh
        patches_h, OH, OW = _im2col_nhwc(xh_nhwc, KH, KW, s, p)
        out_h_slab = pallas_matmul_bias(patches_h, self._w_hh_mat,
                                        self._b_hh_row)          # (M_h, np_h)

        assert OH % 2 == 0, 'OctConv output height not divisible by 2'
        assert OW % 2 == 0, 'OctConv output width not divisible by 2'

        out_l = None
        if self.has_in_l or self.has_out_l:
            parts = []
            OHl = OWl = None
            if self.has_out_l:
                ph = _avg_pool_2x2_nhwc(xh_nhwc)
                patches_ph, OHl, OWl = _im2col_nhwc(ph, KH, KW, s, p)
                parts.append(patches_ph)
            if self.has_in_l:
                xl_nhwc = jnp.transpose(x_l, (0, 2, 3, 1))
                patches_l, OHl, OWl = _im2col_nhwc(xl_nhwc, KH, KW, s, p)
                parts.append(patches_l)
            a_low = parts[0] if len(parts) == 1 else jnp.concatenate(parts, 1)
            low_slab = pallas_matmul_bias(a_low, self._w_low_mat,
                                          self._b_low_row)       # (M_l, np_low)

            if self.has_in_l:
                assert 2 * OHl == OH and 2 * OWl == OW
                lh_part = (low_slab if self._np_low == self._np_h
                           else low_slab[:, :self._np_h])
                out_h_slab = pallas_upsample2x_add(out_h_slab, lh_part,
                                                   N, OHl, OWl)
            if self.has_out_l:
                c0 = self._outl_col0
                out_l = (low_slab[:, c0:c0 + self.out_channels_l]
                         .reshape(N, OHl, OWl, self.out_channels_l)
                         .transpose(0, 3, 1, 2))

        out_h = (out_h_slab[:, :self.out_channels_h]
                 .reshape(N, OH, OW, self.out_channels_h)
                 .transpose(0, 3, 1, 2))
        return out_h, out_l

    def __call__(self, x_h, x_l=None):
        return self._jit_forward(x_h, x_l if self.has_in_l else None)


# ----------------------------------------------------------------------------
# Pure-JAX reference (same bf16 MXU quantization) for correctness check
# ----------------------------------------------------------------------------
def _ref_conv(x, w, b, stride, padding):
    out = jax.lax.conv_general_dilated(
        x.astype(jnp.bfloat16), w.astype(jnp.bfloat16),
        (stride, stride), [(padding, padding), (padding, padding)],
        dimension_numbers=('NCHW', 'OIHW', 'NCHW'),
        preferred_element_type=jnp.float32)
    return out + b[None, :, None, None]


def _ref_avg_pool_2x2(x):
    n, c, h, w = x.shape
    return x.reshape(n, c, h // 2, 2, w // 2, 2).mean(axis=(3, 5))


def _ref_upsample_2x(x):
    return jnp.repeat(jnp.repeat(x, 2, axis=2), 2, axis=3)


def _ref_forward(m, x_h, x_l):
    out_h = _ref_conv(x_h, m.w_hh, m.b_hh, m.stride, m.padding)
    out_l = None
    if m.has_in_l:
        out_h = out_h + _ref_upsample_2x(
            _ref_conv(x_l, m.w_lh, m.b_lh, m.stride, m.padding))
    if m.has_out_l:
        out_l = _ref_conv(_ref_avg_pool_2x2(x_h), m.w_hl, m.b_hl,
                          m.stride, m.padding)
        if m.has_in_l:
            out_l = out_l + _ref_conv(x_l, m.w_ll, m.b_ll, m.stride, m.padding)
    return out_h, out_l


if __name__ == "__main__":
    key = jax.random.PRNGKey(0)
    k_params, k_xh, k_xl = jax.random.split(key, 3)

    # in_channels=16, alpha_in=0.25 -> in_l=4, in_h=12
    # out_channels=16, alpha_out=0.25 -> out_l=4, out_h=12
    in_channels, out_channels = 16, 16
    alpha_in, alpha_out = 0.25, 0.25
    N, H, W = 2, 16, 16

    mod = OctConv2dPallas(in_channels, out_channels, (3, 3),
                          alpha_in, alpha_out, stride=1, padding=1,
                          key=k_params)

    x_h = jax.random.normal(k_xh, (N, mod.in_channels_h, H, W), jnp.float32)
    x_l = jax.random.normal(k_xl, (N, mod.in_channels_l, H // 2, W // 2),
                            jnp.float32)

    out_h, out_l = mod(x_h, x_l)
    out_h = jax.block_until_ready(out_h)
    out_l = jax.block_until_ready(out_l)

    ref_h, ref_l = _ref_forward(mod, x_h, x_l)
    np.testing.assert_allclose(np.asarray(out_h), np.asarray(ref_h),
                               rtol=1e-2, atol=1e-2)
    np.testing.assert_allclose(np.asarray(out_l), np.asarray(ref_l),
                               rtol=1e-2, atol=1e-2)

    assert out_h.shape == (N, mod.out_channels_h, H, W)
    assert out_l.shape == (N, mod.out_channels_l, H // 2, W // 2)

    print("KERNEL_OK")
</pallas_src>

<mosaic_0001>
module attributes {stable_mosaic.version = 11 : i64} {
  func.func @_matmul_bias_kernel(%arg0: i32, %arg1: i32, %arg2: i32, %arg3: memref<512x128xbf16, #tpu.memory_space<vmem>>, %arg4: memref<128x128xbf16, #tpu.memory_space<vmem>>, %arg5: memref<1x128xf32, #tpu.memory_space<vmem>>, %arg6: memref<512x128xf32, #tpu.memory_space<vmem>>, %arg7: memref<512x128xf32, #tpu.memory_space<vmem>>) attributes {dimension_semantics = [#tpu.dimension_semantics<parallel>, #tpu.dimension_semantics<parallel>, #tpu.dimension_semantics<arbitrary>], iteration_bounds = array<i64: 1, 1, 1>, scalar_prefetch = 0 : i64, scratch_operands = 1 : i64, tpu.core_type = #tpu.core_type<tc>, window_params = [{transform_indices = @transform_0, window_bounds = array<i64: 512, 128>}, {transform_indices = @transform_1, window_bounds = array<i64: 128, 128>}, {transform_indices = @transform_2, window_bounds = array<i64: 1, 128>}, {transform_indices = @transform_3, window_bounds = array<i64: 512, 128>}]} {
    %c0_i32 = arith.constant 0 : i32
    %0 = arith.cmpi eq, %arg2, %c0_i32 : i32
    %1 = arith.extui %0 : i1 to i32
    %c0_i32_0 = arith.constant 0 : i32
    %2 = arith.cmpi ne, %1, %c0_i32_0 : i32
    scf.if %2 {
      %cst_10 = arith.constant 0.000000e+00 : f32
      %12 = vector.broadcast %cst_10 : f32 to vector<512x128xf32>
      %c0_11 = arith.constant 0 : index
      %c0_12 = arith.constant 0 : index
      %13 = vector.load %arg7[%c0_11, %c0_12] : memref<512x128xf32, #tpu.memory_space<vmem>>, vector<512x128xf32>
      tpu.vector_store %arg7[%c0_11, %c0_12], %12 {strides = array<i32>} : memref<512x128xf32, #tpu.memory_space<vmem>>, vector<512x128xf32>,
    } else {
    }
    %c0 = arith.constant 0 : index
    %c0_1 = arith.constant 0 : index
    %3 = vector.load %arg7[%c0, %c0_1] : memref<512x128xf32, #tpu.memory_space<vmem>>, vector<512x128xf32>
    %c0_2 = arith.constant 0 : index
    %c0_3 = arith.constant 0 : index
    %4 = vector.load %arg3[%c0_2, %c0_3] : memref<512x128xbf16, #tpu.memory_space<vmem>>, vector<512x128xbf16>
    %c0_4 = arith.constant 0 : index
    %c0_5 = arith.constant 0 : index
    %5 = vector.load %arg4[%c0_4, %c0_5] : memref<128x128xbf16, #tpu.memory_space<vmem>>, vector<128x128xbf16>
    %cst = arith.constant dense<0.000000e+00> : vector<512x128xf32>
    %6 = tpu.matmul %4, %5, %cst {dimension_numbers = #tpu.dot_dimension_numbers<[1], [0], [0], [1], [0, 0, 1, 1], [], []>} : vector<512x128xbf16>, vector<128x128xbf16>, vector<512x128xf32> -> vector<512x128xf32>
    %7 = arith.addf %3, %6 : vector<512x128xf32>
    %c0_6 = arith.constant 0 : index
    %c0_7 = arith.constant 0 : index
    %8 = vector.load %arg7[%c0_6, %c0_7] : memref<512x128xf32, #tpu.memory_space<vmem>>, vector<512x128xf32>
    tpu.vector_store %arg7[%c0_6, %c0_7], %7 {strides = array<i32>} : memref<512x128xf32, #tpu.memory_space<vmem>>, vector<512x128xf32>,
    %c0_i32_8 = arith.constant 0 : i32
    %9 = arith.cmpi eq, %arg2, %c0_i32_8 : i32
    %10 = arith.extui %9 : i1 to i32
    %c0_i32_9 = arith.constant 0 : i32
    %11 = arith.cmpi ne, %10, %c0_i32_9 : i32
    scf.if %11 {
      %c0_10 = arith.constant 0 : index
      %c0_11 = arith.constant 0 : index
      %12 = vector.load %arg7[%c0_10, %c0_11] : memref<512x128xf32, #tpu.memory_space<vmem>>, vector<512x128xf32>
      %c0_12 = arith.constant 0 : index
      %c0_13 = arith.constant 0 : index
      %13 = vector.load %arg5[%c0_12, %c0_13] : memref<1x128xf32, #tpu.memory_space<vmem>>, vector<1x128xf32>
      %14 = vector.broadcast %13 : vector<1x128xf32> to vector<512x128xf32>
      %15 = arith.addf %12, %14 : vector<512x128xf32>
      %c0_14 = arith.constant 0 : index
      %c0_15 = arith.constant 0 : index
      %16 = vector.load %arg6[%c0_14, %c0_15] : memref<512x128xf32, #tpu.memory_space<vmem>>, vector<512x128xf32>
      tpu.vector_store %arg6[%c0_14, %c0_15], %15 {strides = array<i32>} : memref<512x128xf32, #tpu.memory_space<vmem>>, vector<512x128xf32>,
    } else {
    }
    return
  }
  func.func @transform_0(%arg0: i32, %arg1: i32, %arg2: i32) -> (i32, i32) {
    %c0_i32 = arith.constant 0 : i32
    return %arg0, %arg2 : i32, i32
  }
  func.func @transform_1(%arg0: i32, %arg1: i32, %arg2: i32) -> (i32, i32) {
    %c0_i32 = arith.constant 0 : i32
    return %arg2, %arg1 : i32, i32
  }
  func.func @transform_2(%arg0: i32, %arg1: i32, %arg2: i32) -> (i32, i32) {
    %c0_i32 = arith.constant 0 : i32
    %c0_i32_0 = arith.constant 0 : i32
    return %c0_i32, %arg1 : i32, i32
  }
  func.func @transform_3(%arg0: i32, %arg1: i32, %arg2: i32) -> (i32, i32) {
    %c0_i32 = arith.constant 0 : i32
    return %arg0, %arg1 : i32, i32
  }
}

module attributes {stable_mosaic.version = 11 : i64} {
  func.func @_matmul_bias_kernel(%arg0: i32, %arg1: i32, %arg2: i32, %arg3: memref<128x256xbf16, #tpu.memory_space<vmem>>, %arg4: memref<256x128xbf16, #tpu.memory_space<vmem>>, %arg5: memref<1x128xf32, #tpu.memory_space<vmem>>, %arg6: memref<128x128xf32, #tpu.memory_space<vmem>>, %arg7: memref<128x128xf32, #tpu.memory_space<vmem>>) attributes {dimension_semantics = [#tpu.dimension_semantics<parallel>, #tpu.dimension_semantics<parallel>, #tpu.dimension_semantics<arbitrary>], iteration_bounds = array<i64: 1, 1, 1>, scalar_prefetch = 0 : i64, scratch_operands = 1 : i64, tpu.core_type = #tpu.core_type<tc>, window_params = [{transform_indices = @transform_0, window_bounds = array<i64: 128, 256>}, {transform_indices = @transform_1, window_bounds = array<i64: 256, 128>}, {transform_indices = @transform_2, window_bounds = array<i64: 1, 128>}, {transform_indices = @transform_3, window_bounds = array<i64: 128, 128>}]} {
    %c0_i32 = arith.constant 0 : i32
    %0 = arith.cmpi eq, %arg2, %c0_i32 : i32
    %1 = arith.extui %0 : i1 to i32
    %c0_i32_0 = arith.constant 0 : i32
    %2 = arith.cmpi ne, %1, %c0_i32_0 : i32
    scf.if %2 {
      %cst_10 = arith.constant 0.000000e+00 : f32
      %12 = vector.broadcast %cst_10 : f32 to vector<128x128xf32>
      %c0_11 = arith.constant 0 : index
      %c0_12 = arith.constant 0 : index
      %13 = vector.load %arg7[%c0_11, %c0_12] : memref<128x128xf32, #tpu.memory_space<vmem>>, vector<128x128xf32>
      tpu.vector_store %arg7[%c0_11, %c0_12], %12 {strides = array<i32>} : memref<128x128xf32, #tpu.memory_space<vmem>>, vector<128x128xf32>,
    } else {
    }
    %c0 = arith.constant 0 : index
    %c0_1 = arith.constant 0 : index
    %3 = vector.load %arg7[%c0, %c0_1] : memref<128x128xf32, #tpu.memory_space<vmem>>, vector<128x128xf32>
    %c0_2 = arith.constant 0 : index
    %c0_3 = arith.constant 0 : index
    %4 = vector.load %arg3[%c0_2, %c0_3] : memref<128x256xbf16, #tpu.memory_space<vmem>>, vector<128x256xbf16>
    %c0_4 = arith.constant 0 : index
    %c0_5 = arith.constant 0 : index
    %5 = vector.load %arg4[%c0_4, %c0_5] : memref<256x128xbf16, #tpu.memory_space<vmem>>, vector<256x128xbf16>
    %cst = arith.constant dense<0.000000e+00> : vector<128x128xf32>
    %6 = tpu.matmul %4, %5, %cst {dimension_numbers = #tpu.dot_dimension_numbers<[1], [0], [0], [1], [0, 0, 1, 1], [], []>} : vector<128x256xbf16>, vector<256x128xbf16>, vector<128x128xf32> -> vector<128x128xf32>
    %7 = arith.addf %3, %6 : vector<128x128xf32>
    %c0_6 = arith.constant 0 : index
    %c0_7 = arith.constant 0 : index
    %8 = vector.load %arg7[%c0_6, %c0_7] : memref<128x128xf32, #tpu.memory_space<vmem>>, vector<128x128xf32>
    tpu.vector_store %arg7[%c0_6, %c0_7], %7 {strides = array<i32>} : memref<128x128xf32, #tpu.memory_space<vmem>>, vector<128x128xf32>,
    %c0_i32_8 = arith.constant 0 : i32
    %9 = arith.cmpi eq, %arg2, %c0_i32_8 : i32
    %10 = arith.extui %9 : i1 to i32
    %c0_i32_9 = arith.constant 0 : i32
    %11 = arith.cmpi ne, %10, %c0_i32_9 : i32
    scf.if %11 {
      %c0_10 = arith.constant 0 : index
      %c0_11 = arith.constant 0 : index
      %12 = vector.load %arg7[%c0_10, %c0_11] : memref<128x128xf32, #tpu.memory_space<vmem>>, vector<128x128xf32>
      %c0_12 = arith.constant 0 : index
      %c0_13 = arith.constant 0 : index
      %13 = vector.load %arg5[%c0_12, %c0_13] : memref<1x128xf32, #tpu.memory_space<vmem>>, vector<1x128xf32>
      %14 = vector.broadcast %13 : vector<1x128xf32> to vector<128x128xf32>
      %15 = arith.addf %12, %14 : vector<128x128xf32>
      %c0_14 = arith.constant 0 : index
      %c0_15 = arith.constant 0 : index
      %16 = vector.load %arg6[%c0_14, %c0_15] : memref<128x128xf32, #tpu.memory_space<vmem>>, vector<128x128xf32>
      tpu.vector_store %arg6[%c0_14, %c0_15], %15 {strides = array<i32>} : memref<128x128xf32, #tpu.memory_space<vmem>>, vector<128x128xf32>,
    } else {
    }
    return
  }
  func.func @transform_0(%arg0: i32, %arg1: i32, %arg2: i32) -> (i32, i32) {
    %c0_i32 = arith.constant 0 : i32
    return %arg0, %arg2 : i32, i32
  }
  func.func @transform_1(%arg0: i32, %arg1: i32, %arg2: i32) -> (i32, i32) {
    %c0_i32 = arith.constant 0 : i32
    return %arg2, %arg1 : i32, i32
  }
  func.func @transform_2(%arg0: i32, %arg1: i32, %arg2: i32) -> (i32, i32) {
    %c0_i32 = arith.constant 0 : i32
    %c0_i32_0 = arith.constant 0 : i32
    return %c0_i32, %arg1 : i32, i32
  }
  func.func @transform_3(%arg0: i32, %arg1: i32, %arg2: i32) -> (i32, i32) {
    %c0_i32 = arith.constant 0 : i32
    return %arg0, %arg1 : i32, i32
  }
}

module attributes {stable_mosaic.version = 11 : i64} {
  func.func @_upsample_add_kernel(%arg0: i32, %arg1: memref<16x2x8x2x128xf32, #tpu.memory_space<vmem>>, %arg2: memref<16x1x8x1x128xf32, #tpu.memory_space<vmem>>, %arg3: memref<16x2x8x2x128xf32, #tpu.memory_space<vmem>>) attributes {dimension_semantics = [#tpu.dimension_semantics<parallel>], iteration_bounds = array<i64: 1>, scalar_prefetch = 0 : i64, scratch_operands = 0 : i64, tpu.core_type = #tpu.core_type<tc>, window_params = [{transform_indices = @transform_0, window_bounds = array<i64: 16, 2, 8, 2, 128>}, {transform_indices = @transform_1, window_bounds = array<i64: 16, 1, 8, 1, 128>}, {transform_indices = @transform_2, window_bounds = array<i64: 16, 2, 8, 2, 128>}]} {
    %c0 = arith.constant 0 : index
    %c0_0 = arith.constant 0 : index
    %c0_1 = arith.constant 0 : index
    %c0_2 = arith.constant 0 : index
    %c0_3 = arith.constant 0 : index
    %0 = vector.load %arg2[%c0, %c0_0, %c0_1, %c0_2, %c0_3] : memref<16x1x8x1x128xf32, #tpu.memory_space<vmem>>, vector<16x1x8x1x128xf32>
    %1 = tpu.concatenate %0, %0 in 1 : vector<16x1x8x1x128xf32>, vector<16x1x8x1x128xf32> -> vector<16x2x8x1x128xf32>
    %c0_4 = arith.constant 0 : index
    %c0_5 = arith.constant 0 : index
    %c0_6 = arith.constant 0 : index
    %c0_7 = arith.constant 0 : index
    %c0_8 = arith.constant 0 : index
    %2 = vector.load %arg1[%c0_4, %c0_5, %c0_6, %c0_7, %c0_8] : memref<16x2x8x2x128xf32, #tpu.memory_space<vmem>>, vector<16x2x8x2x128xf32>
    %3 = vector.broadcast %1 : vector<16x2x8x1x128xf32> to vector<16x2x8x2x128xf32>
    %4 = arith.addf %2, %3 : vector<16x2x8x2x128xf32>
    %c0_9 = arith.constant 0 : index
    %c0_10 = arith.constant 0 : index
    %c0_11 = arith.constant 0 : index
    %c0_12 = arith.constant 0 : index
    %c0_13 = arith.constant 0 : index
    %5 = vector.load %arg3[%c0_9, %c0_10, %c0_11, %c0_12, %c0_13] : memref<16x2x8x2x128xf32, #tpu.memory_space<vmem>>, vector<16x2x8x2x128xf32>
    tpu.vector_store %arg3[%c0_9, %c0_10, %c0_11, %c0_12, %c0_13], %4 {strides = array<i32>} : memref<16x2x8x2x128xf32, #tpu.memory_space<vmem>>, vector<16x2x8x2x128xf32>,
    return
  }
  func.func @transform_0(%arg0: i32) -> (i32, i32, i32, i32, i32) {
    %c0_i32 = arith.constant 0 : i32
    %c0_i32_0 = arith.constant 0 : i32
    %c0_i32_1 = arith.constant 0 : i32
    %c0_i32_2 = arith.constant 0 : i32
    %c0_i32_3 = arith.constant 0 : i32
    return %arg0, %c0_i32, %c0_i32_0, %c0_i32_1, %c0_i32_2 : i32, i32, i32, i32, i32
  }
  func.func @transform_1(%arg0: i32) -> (i32, i32, i32, i32, i32) {
    %c0_i32 = arith.constant 0 : i32
    %c0_i32_0 = arith.constant 0 : i32
    %c0_i32_1 = arith.constant 0 : i32
    %c0_i32_2 = arith.constant 0 : i32
    %c0_i32_3 = arith.constant 0 : i32
    return %arg0, %c0_i32, %c0_i32_0, %c0_i32_1, %c0_i32_2 : i32, i32, i32, i32, i32
  }
  func.func @transform_2(%arg0: i32) -> (i32, i32, i32, i32, i32) {
    %c0_i32 = arith.constant 0 : i32
    %c0_i32_0 = arith.constant 0 : i32
    %c0_i32_1 = arith.constant 0 : i32
    %c0_i32_2 = arith.constant 0 : i32
    %c0_i32_3 = arith.constant 0 : i32
    return %arg0, %c0_i32, %c0_i32_0, %c0_i32_1, %c0_i32_2 : i32, i32, i32, i32, i32
  }
}

</mosaic_0001>

<bundles_post_ra>
// kernel: _forward.3
= control target key start
LH: loop header
LB: loop body
LE: loop exit
PB: predicated region body
PF: predicated region fallthrough
CT: control target
= control target key end

     0   :  { %s1708_s1 = inlined_call_operand.vmem [shape: bf16[128,128], index: 1, kind: input, shape index: {}]   ;;  %s1709_s0 = inlined_call_operand.vmem [shape: bf16[512,128], index: 0, kind: input, shape index: {}]   ;;  %s1710_s2 = inlined_call_operand.vmem [shape: f32[1,128], index: 2, kind: input, shape index: {}]   ;;  %s1711_s3 = inlined_call_operand.vmem [shape: f32[512,128], index: 3, kind: output, shape index: {}]  }
   0x1   :  { %v1267_v0 = vld [vmem:[%s1708_s1] sm:$0xff]   ;;  %v1268_v1 = vld [vmem:[%s1708_s1 + $0x8] sm:$0xff]   ;;  %v1269_v2 = vld [vmem:[%s1708_s1 + $0x10] sm:$0xff]  }
   0x2   :  { %1171 = vmatprep.subr.bf16.mxu0 %v1267_v0  ;;  %1251 = vmatprep.subr.bf16.mxu1 %v1267_v0  ;;  %v1270_v3 = vld [vmem:[%s1708_s1 + $0x18] sm:$0xff]   ;;  %v1275_v4 = vld [vmem:[%s1709_s0] sm:$0xff]   ;;  %v1272_v7 = vld [vmem:[%s1708_s1 + $0x28] sm:$0xff]  }
   0x3   :  { %1172 = vmatpush3.bf16.msra.mxu0 %v1267_v0  ;;  %1259 = vmatpush3.bf16.msra.mxu1 %v1267_v0  ;;  %v1276_v5 = vld [vmem:[%s1709_s0 + $0x80] sm:$0xff]   ;;  %v1273_v8 = vld [vmem:[%s1708_s1 + $0x30] sm:$0xff]   ;;  %v1274_v9 = vld [vmem:[%s1708_s1 + $0x38] sm:$0xff]  }
   0x4   :  { %1173 = vmatprep.subr.bf16.mxu0 %v1268_v1  ;;  %1252 = vmatprep.subr.bf16.mxu1 %v1268_v1  ;;  %v1271_v6 = vld [vmem:[%s1708_s1 + $0x20] sm:$0xff]   ;;  %v1277_v10 = vld [vmem:[%s1709_s0 + $0x8] sm:$0xff]   ;;  %v1279_v12 = vld [vmem:[%s1709_s0 + $0x10] sm:$0xff]  }
   0x5   :  { %1187 = vmatprep.mubr.bf16.mxu0 %v1275_v4  ;;  %1219 = vmatprep.mubr.bf16.mxu1 %v1276_v5  ;;  %v1278_v11 = vld [vmem:[%s1709_s0 + $0x88] sm:$0xff]   ;;  %v1280_v13 = vld [vmem:[%s1709_s0 + $0x90] sm:$0xff]   ;;  %v1281_v14 = vld [vmem:[%s1709_s0 + $0x18] sm:$0xff]  }
   0x6   :  { %v1282_v15 = vld [vmem:[%s1709_s0 + $0x98] sm:$0xff]   ;;  %v1283_v16 = vld [vmem:[%s1709_s0 + $0x20] sm:$0xff]   ;;  %v1285_v18 = vld [vmem:[%s1709_s0 + $0x28] sm:$0xff]  }
   0x7   :  { %1174 = vmatpush3.bf16.msra.mxu0 %v1268_v1  ;;  %1260 = vmatpush3.bf16.msra.mxu1 %v1268_v1  ;;  %v1284_v17 = vld [vmem:[%s1709_s0 + $0xa0] sm:$0xff]   ;;  %v1286_v19 = vld [vmem:[%s1709_s0 + $0xa8] sm:$0xff]   ;;  %v1287_v20 = vld [vmem:[%s1709_s0 + $0x30] sm:$0xff]  }
   0x8   :  { %1175 = vmatprep.subr.bf16.mxu0 %v1269_v2  ;;  %1253 = vmatprep.subr.bf16.mxu1 %v1269_v2  ;;  %v1288_v21 = vld [vmem:[%s1709_s0 + $0xb0] sm:$0xff]   ;;  %v1289_v22 = vld [vmem:[%s1709_s0 + $0x38] sm:$0xff]   ;;  %v1291_v24 = vld [vmem:[%s1709_s0 + $0x40] sm:$0xff]  }
   0x9   :  { %v1290_v23 = vld [vmem:[%s1709_s0 + $0xb8] sm:$0xff]   ;;  %v1292_v25 = vld [vmem:[%s1709_s0 + $0xc0] sm:$0xff]   ;;  %v1293_v26 = vld [vmem:[%s1709_s0 + $0x48] sm:$0xff]  }
   0xa   :  { %v1294_v27 = vld [vmem:[%s1709_s0 + $0xc8] sm:$0xff]   ;;  %v1295_v28 = vld [vmem:[%s1709_s0 + $0x50] sm:$0xff]   ;;  %v1297_v30 = vld [vmem:[%s1709_s0 + $0x58] sm:$0xff]  }
   0xb   :  { %1176 = vmatpush3.bf16.msra.mxu0 %v1269_v2  ;;  %1261 = vmatpush3.bf16.msra.mxu1 %v1269_v2  ;;  %v1296_v29 = vld [vmem:[%s1709_s0 + $0xd0] sm:$0xff]   ;;  %v1298_v31 = vld [vmem:[%s1709_s0 + $0xd8] sm:$0xff]   ;;  %v1299_v32 = vld [vmem:[%s1709_s0 + $0x60] sm:$0xff]  }
   0xc   :  { %1177 = vmatprep.subr.bf16.mxu0 %v1270_v3  ;;  %1254 = vmatprep.subr.bf16.mxu1 %v1270_v3  ;;  %v1300_v33 = vld [vmem:[%s1709_s0 + $0xe0] sm:$0xff]   ;;  %v1301_v34 = vld [vmem:[%s1709_s0 + $0x68] sm:$0xff]   ;;  %v1303_v36 = vld [vmem:[%s1709_s0 + $0x70] sm:$0xff]  }
   0xd   :  { %v1302_v35 = vld [vmem:[%s1709_s0 + $0xe8] sm:$0xff]   ;;  %v1304_v37 = vld [vmem:[%s1709_s0 + $0xf0] sm:$0xff]   ;;  %v1305_v38 = vld [vmem:[%s1709_s0 + $0x78] sm:$0xff]  }
   0xe   :  { %v1306_v39 = vld [vmem:[%s1709_s0 + $0xf8] sm:$0xff]   ;;  %v1450_v40 = vld [vmem:[%s1710_s2] ss:$0 sm:$0xff] }
   0xf   :  { %1178 = vmatpush3.bf16.msra.mxu0 %v1270_v3  ;;  %1262 = vmatpush3.bf16.msra.mxu1 %v1270_v3 }
  0x10   :  { %1179 = vmatprep.subr.bf16.mxu0 %v1271_v6  ;;  %1255 = vmatprep.subr.bf16.mxu1 %v1271_v6 }
  0x13   :  { %1180 = vmatpush3.bf16.msra.mxu0 %v1271_v6  ;;  %1263 = vmatpush3.bf16.msra.mxu1 %v1271_v6 }
  0x14   :  { %1181 = vmatprep.subr.bf16.mxu0 %v1272_v7  ;;  %1256 = vmatprep.subr.bf16.mxu1 %v1272_v7 }
  0x17   :  { %1182 = vmatpush3.bf16.msra.mxu0 %v1272_v7  ;;  %1264 = vmatpush3.bf16.msra.mxu1 %v1272_v7 }
  0x18   :  { %1183 = vmatprep.subr.bf16.mxu0 %v1273_v8  ;;  %1257 = vmatprep.subr.bf16.mxu1 %v1273_v8 }
  0x1b   :  { %1184 = vmatpush3.bf16.msra.mxu0 %v1273_v8  ;;  %1265 = vmatpush3.bf16.msra.mxu1 %v1273_v8 }
  0x1c   :  { %1185 = vmatprep.subr.bf16.mxu0 %v1274_v9  ;;  %1258 = vmatprep.subr.bf16.mxu1 %v1274_v9 }
  0x1f   :  { %1186 = vmatpush3.bf16.msra.mxu0 %v1274_v9  ;;  %1266 = vmatpush3.bf16.msra.mxu1 %v1274_v9 }
  0x22   :  { %1188 = vmatmul.mubr.bf16.vlgmr.msra.gmra.mrb[0].mxu0 %v1277_v10  ;;  %1220 = vmatmul.mubr.bf16.vlgmr.msra.gmra.mrb[0].mxu1 %v1278_v11 }
  0x23   :  { %1191 = vmatprep.mubr.bf16.mxu0 %v1279_v12  ;;  %1223 = vmatprep.mubr.bf16.mxu1 %v1280_v13 }
  0x2a   :  { %1192 = vmatmul.mubr.bf16.gmra.mrb[4].mxu0 %v1281_v14  ;;  %1224 = vmatmul.mubr.bf16.gmra.mrb[4].mxu1 %v1282_v15 }
  0x2b   :  { %1195 = vmatprep.mubr.bf16.mxu0 %v1283_v16  ;;  %1227 = vmatprep.mubr.bf16.mxu1 %v1284_v17 }
  0x32   :  { %1196 = vmatmul.mubr.bf16.gmra.mrb[8].mxu0 %v1285_v18  ;;  %1228 = vmatmul.mubr.bf16.gmra.mrb[8].mxu1 %v1286_v19 }
  0x33   :  { %1199 = vmatprep.mubr.bf16.mxu0 %v1287_v20  ;;  %1231 = vmatprep.mubr.bf16.mxu1 %v1288_v21 }
  0x3a   :  { %1200 = vmatmul.mubr.bf16.gmra.mrb[12].mxu0 %v1289_v22  ;;  %1232 = vmatmul.mubr.bf16.gmra.mrb[12].mxu1 %v1290_v23 }
  0x3b   :  { %1203 = vmatprep.mubr.bf16.mxu0 %v1291_v24  ;;  %1235 = vmatprep.mubr.bf16.mxu1 %v1292_v25 }
  0x42   :  { %1204 = vmatmul.mubr.bf16.gmra.mrb[16].mxu0 %v1293_v26  ;;  %1236 = vmatmul.mubr.bf16.gmra.mrb[16].mxu1 %v1294_v27 }
  0x43   :  { %1207 = vmatprep.mubr.bf16.mxu0 %v1295_v28  ;;  %1239 = vmatprep.mubr.bf16.mxu1 %v1296_v29 }
  0x4a   :  { %1208 = vmatmul.mubr.bf16.gmra.mrb[20].mxu0 %v1297_v30  ;;  %1240 = vmatmul.mubr.bf16.gmra.mrb[20].mxu1 %v1298_v31 }
  0x4b   :  { %1211 = vmatprep.mubr.bf16.mxu0 %v1299_v32  ;;  %1243 = vmatprep.mubr.bf16.mxu1 %v1300_v33 }
  0x52   :  { %1212 = vmatmul.mubr.bf16.gmra.mrb[24].mxu0 %v1301_v34  ;;  %1244 = vmatmul.mubr.bf16.gmra.mrb[24].mxu1 %v1302_v35 }
  0x53   :  { %1215 = vmatprep.mubr.bf16.mxu0 %v1303_v36  ;;  %1247 = vmatprep.mubr.bf16.mxu1 %v1304_v37 }
  0x5a   :  { %1216 = vmatmul.mubr.bf16.gmra.mrb[28].mxu0 %v1305_v38  ;;  %1248 = vmatmul.mubr.bf16.gmra.mrb[28].mxu1 %v1306_v39 }
  0xf5   :  { %v1189_v41 = vpop.f32.mrb[0].mxu0  ;;  %v1221_v42 = vpop.f32.mrb[0].mxu1 }
  0xf6   :  { %v960_v43 = vadd.f32 %v1189_v41, %v1450_v40  ;;  %v992_v44 = vadd.f32 %v1221_v42, %v1450_v40  ;;  %v501_v45 = vpop.f32.mrb[1].mxu0  ;;  %v629_v46 = vpop.f32.mrb[1].mxu1 }
  0xf7   :  { %v958_v47 = vadd.f32 %v1450_v40, %v501_v45  ;;  %v990_v48 = vadd.f32 %v1450_v40, %v629_v46  ;;  %v1190_v49 = vpop.f32.mrb[2].mxu0  ;;  %v1222_v50 = vpop.f32.mrb[2].mxu1 }
  0xf8   :  { %1024 = vst [vmem:[%s1711_s3 + $0x10] sm:$0xff] %v960_v43  ;;  %1056 = vst [vmem:[%s1711_s3 + $0x110] sm:$0xff] %v992_v44  ;;  %v961_v51 = vadd.f32 %v1190_v49, %v1450_v40  ;;  %v993_v52 = vadd.f32 %v1222_v50, %v1450_v40  ;;  %v504_v53 = vpop.f32.mrb[3].mxu0  ;;  %v632_v54 = vpop.f32.mrb[3].mxu1 }
  0xf9   :  { %1022 = vst [vmem:[%s1711_s3] sm:$0xff] %v958_v47  ;;  %1054 = vst [vmem:[%s1711_s3 + $0x100] sm:$0xff] %v990_v48  ;;  %v959_v55 = vadd.f32 %v1450_v40, %v504_v53  ;;  %v991_v56 = vadd.f32 %v1450_v40, %v632_v54 }
  0xfa   :  { %1025 = vst [vmem:[%s1711_s3 + $0x18] sm:$0xff] %v961_v51  ;;  %1057 = vst [vmem:[%s1711_s3 + $0x118] sm:$0xff] %v993_v52 }
  0xfb   :  { %1023 = vst [vmem:[%s1711_s3 + $0x8] sm:$0xff] %v959_v55  ;;  %1055 = vst [vmem:[%s1711_s3 + $0x108] sm:$0xff] %v991_v56 }
  0xfd   :  { %v1193_v57 = vpop.f32.mrb[4].mxu0  ;;  %v1225_v58 = vpop.f32.mrb[4].mxu1 }
  0xfe   :  { %v964_v59 = vadd.f32 %v1193_v57, %v1450_v40  ;;  %v996_v60 = vadd.f32 %v1225_v58, %v1450_v40  ;;  %v517_v61 = vpop.f32.mrb[5].mxu0  ;;  %v645_v62 = vpop.f32.mrb[5].mxu1 }
  0xff   :  { %v962_v63 = vadd.f32 %v1450_v40, %v517_v61  ;;  %v994_v0 = vadd.f32 %v1450_v40, %v645_v62  ;;  %v1194_v1 = vpop.f32.mrb[6].mxu0  ;;  %v1226_v2 = vpop.f32.mrb[6].mxu1 }
 0x100   :  { %1028 = vst [vmem:[%s1711_s3 + $0x30] sm:$0xff] %v964_v59  ;;  %1060 = vst [vmem:[%s1711_s3 + $0x130] sm:$0xff] %v996_v60  ;;  %v965_v3 = vadd.f32 %v1194_v1, %v1450_v40  ;;  %v997_v4 = vadd.f32 %v1226_v2, %v1450_v40  ;;  %v520_v5 = vpop.f32.mrb[7].mxu0  ;;  %v648_v6 = vpop.f32.mrb[7].mxu1 }
 0x101   :  { %1026 = vst [vmem:[%s1711_s3 + $0x20] sm:$0xff] %v962_v63  ;;  %1058 = vst [vmem:[%s1711_s3 + $0x120] sm:$0xff] %v994_v0  ;;  %v963_v7 = vadd.f32 %v1450_v40, %v520_v5  ;;  %v995_v8 = vadd.f32 %v1450_v40, %v648_v6 }
 0x102   :  { %1029 = vst [vmem:[%s1711_s3 + $0x38] sm:$0xff] %v965_v3  ;;  %1061 = vst [vmem:[%s1711_s3 + $0x138] sm:$0xff] %v997_v4 }
 0x103   :  { %1027 = vst [vmem:[%s1711_s3 + $0x28] sm:$0xff] %v963_v7  ;;  %1059 = vst [vmem:[%s1711_s3 + $0x128] sm:$0xff] %v995_v8 }
 0x105   :  { %v1197_v9 = vpop.f32.mrb[8].mxu0  ;;  %v1229_v10 = vpop.f32.mrb[8].mxu1 }
 0x106   :  { %v968_v11 = vadd.f32 %v1197_v9, %v1450_v40  ;;  %v1000_v12 = vadd.f32 %v1229_v10, %v1450_v40  ;;  %v533_v13 = vpop.f32.mrb[9].mxu0  ;;  %v661_v14 = vpop.f32.mrb[9].mxu1 }
 0x107   :  { %v966_v15 = vadd.f32 %v1450_v40, %v533_v13  ;;  %v998_v16 = vadd.f32 %v1450_v40, %v661_v14  ;;  %v1198_v17 = vpop.f32.mrb[10].mxu0  ;;  %v1230_v18 = vpop.f32.mrb[10].mxu1 }
 0x108   :  { %1032 = vst [vmem:[%s1711_s3 + $0x50] sm:$0xff] %v968_v11  ;;  %1064 = vst [vmem:[%s1711_s3 + $0x150] sm:$0xff] %v1000_v12  ;;  %v969_v19 = vadd.f32 %v1198_v17, %v1450_v40  ;;  %v1001_v20 = vadd.f32 %v1230_v18, %v1450_v40  ;;  %v536_v21 = vpop.f32.mrb[11].mxu0  ;;  %v664_v22 = vpop.f32.mrb[11].mxu1 }
 0x109   :  { %1030 = vst [vmem:[%s1711_s3 + $0x40] sm:$0xff] %v966_v15  ;;  %1062 = vst [vmem:[%s1711_s3 + $0x140] sm:$0xff] %v998_v16  ;;  %v967_v23 = vadd.f32 %v1450_v40, %v536_v21  ;;  %v999_v24 = vadd.f32 %v1450_v40, %v664_v22 }
 0x10a   :  { %1033 = vst [vmem:[%s1711_s3 + $0x58] sm:$0xff] %v969_v19  ;;  %1065 = vst [vmem:[%s1711_s3 + $0x158] sm:$0xff] %v1001_v20 }
 0x10b   :  { %1031 = vst [vmem:[%s1711_s3 + $0x48] sm:$0xff] %v967_v23  ;;  %1063 = vst [vmem:[%s1711_s3 + $0x148] sm:$0xff] %v999_v24 }
 0x10d   :  { %v1201_v25 = vpop.f32.mrb[12].mxu0  ;;  %v1233_v26 = vpop.f32.mrb[12].mxu1 }
 0x10e   :  { %v972_v27 = vadd.f32 %v1201_v25, %v1450_v40  ;;  %v1004_v28 = vadd.f32 %v1233_v26, %v1450_v40  ;;  %v549_v29 = vpop.f32.mrb[13].mxu0  ;;  %v677_v30 = vpop.f32.mrb[13].mxu1 }
 0x10f   :  { %v970_v31 = vadd.f32 %v1450_v40, %v549_v29  ;;  %v1002_v32 = vadd.f32 %v1450_v40, %v677_v30  ;;  %v1202_v33 = vpop.f32.mrb[14].mxu0  ;;  %v1234_v34 = vpop.f32.mrb[14].mxu1 }
 0x110   :  { %1036 = vst [vmem:[%s1711_s3 + $0x70] sm:$0xff] %v972_v27  ;;  %1068 = vst [vmem:[%s1711_s3 + $0x170] sm:$0xff] %v1004_v28  ;;  %v973_v35 = vadd.f32 %v1202_v33, %v1450_v40  ;;  %v1005_v36 = vadd.f32 %v1234_v34, %v1450_v40  ;;  %v552_v37 = vpop.f32.mrb[15].mxu0  ;;  %v680_v38 = vpop.f32.mrb[15].mxu1 }
 0x111   :  { %1034 = vst [vmem:[%s1711_s3 + $0x60] sm:$0xff] %v970_v31  ;;  %1066 = vst [vmem:[%s1711_s3 + $0x160] sm:$0xff] %v1002_v32  ;;  %v971_v39 = vadd.f32 %v1450_v40, %v552_v37  ;;  %v1003_v41 = vadd.f32 %v1450_v40, %v680_v38 }
 0x112   :  { %1037 = vst [vmem:[%s1711_s3 + $0x78] sm:$0xff] %v973_v35  ;;  %1069 = vst [vmem:[%s1711_s3 + $0x178] sm:$0xff] %v1005_v36 }
 0x113   :  { %1035 = vst [vmem:[%s1711_s3 + $0x68] sm:$0xff] %v971_v39  ;;  %1067 = vst [vmem:[%s1711_s3 + $0x168] sm:$0xff] %v1003_v41 }
 0x115   :  { %v1205_v42 = vpop.f32.mrb[16].mxu0  ;;  %v1237_v43 = vpop.f32.mrb[16].mxu1 }
 0x116   :  { %v976_v44 = vadd.f32 %v1205_v42, %v1450_v40  ;;  %v1008_v45 = vadd.f32 %v1237_v43, %v1450_v40  ;;  %v565_v46 = vpop.f32.mrb[17].mxu0  ;;  %v693_v47 = vpop.f32.mrb[17].mxu1 }
 0x117   :  { %v974_v48 = vadd.f32 %v1450_v40, %v565_v46  ;;  %v1006_v49 = vadd.f32 %v1450_v40, %v693_v47  ;;  %v1206_v50 = vpop.f32.mrb[18].mxu0  ;;  %v1238_v51 = vpop.f32.mrb[18].mxu1 }
 0x118   :  { %1040 = vst [vmem:[%s1711_s3 + $0x90] sm:$0xff] %v976_v44  ;;  %1072 = vst [vmem:[%s1711_s3 + $0x190] sm:$0xff] %v1008_v45  ;;  %v977_v52 = vadd.f32 %v1206_v50, %v1450_v40  ;;  %v1009_v53 = vadd.f32 %v1238_v51, %v1450_v40  ;;  %v568_v54 = vpop.f32.mrb[19].mxu0  ;;  %v696_v55 = vpop.f32.mrb[19].mxu1 }
 0x119   :  { %1038 = vst [vmem:[%s1711_s3 + $0x80] sm:$0xff] %v974_v48  ;;  %1070 = vst [vmem:[%s1711_s3 + $0x180] sm:$0xff] %v1006_v49  ;;  %v975_v56 = vadd.f32 %v1450_v40, %v568_v54  ;;  %v1007_v57 = vadd.f32 %v1450_v40, %v696_v55 }
 0x11a   :  { %1041 = vst [vmem:[%s1711_s3 + $0x98] sm:$0xff] %v977_v52  ;;  %1073 = vst [vmem:[%s1711_s3 + $0x198] sm:$0xff] %v1009_v53 }
 0x11b   :  { %1039 = vst [vmem:[%s1711_s3 + $0x88] sm:$0xff] %v975_v56  ;;  %1071 = vst [vmem:[%s1711_s3 + $0x188] sm:$0xff] %v1007_v57 }
 0x11d   :  { %v1209_v58 = vpop.f32.mrb[20].mxu0  ;;  %v1241_v59 = vpop.f32.mrb[20].mxu1 }
 0x11e   :  { %v980_v60 = vadd.f32 %v1209_v58, %v1450_v40  ;;  %v1012_v61 = vadd.f32 %v1241_v59, %v1450_v40  ;;  %v581_v62 = vpop.f32.mrb[21].mxu0  ;;  %v709_v63 = vpop.f32.mrb[21].mxu1 }
 0x11f   :  { %v978_v0 = vadd.f32 %v1450_v40, %v581_v62  ;;  %v1010_v1 = vadd.f32 %v1450_v40, %v709_v63  ;;  %v1210_v2 = vpop.f32.mrb[22].mxu0  ;;  %v1242_v3 = vpop.f32.mrb[22].mxu1 }
 0x120   :  { %1044 = vst [vmem:[%s1711_s3 + $0xb0] sm:$0xff] %v980_v60  ;;  %1076 = vst [vmem:[%s1711_s3 + $0x1b0] sm:$0xff] %v1012_v61  ;;  %v981_v4 = vadd.f32 %v1210_v2, %v1450_v40  ;;  %v1013_v5 = vadd.f32 %v1242_v3, %v1450_v40  ;;  %v584_v6 = vpop.f32.mrb[23].mxu0  ;;  %v712_v7 = vpop.f32.mrb[23].mxu1 }
 0x121   :  { %1042 = vst [vmem:[%s1711_s3 + $0xa0] sm:$0xff] %v978_v0  ;;  %1074 = vst [vmem:[%s1711_s3 + $0x1a0] sm:$0xff] %v1010_v1  ;;  %v979_v8 = vadd.f32 %v1450_v40, %v584_v6  ;;  %v1011_v9 = vadd.f32 %v1450_v40, %v712_v7 }
 0x122   :  { %1045 = vst [vmem:[%s1711_s3 + $0xb8] sm:$0xff] %v981_v4  ;;  %1077 = vst [vmem:[%s1711_s3 + $0x1b8] sm:$0xff] %v1013_v5 }
 0x123   :  { %1043 = vst [vmem:[%s1711_s3 + $0xa8] sm:$0xff] %v979_v8  ;;  %1075 = vst [vmem:[%s1711_s3 + $0x1a8] sm:$0xff] %v1011_v9 }
 0x125   :  { %v1213_v10 = vpop.f32.mrb[24].mxu0  ;;  %v1245_v11 = vpop.f32.mrb[24].mxu1 }
 0x126   :  { %v984_v12 = vadd.f32 %v1213_v10, %v1450_v40  ;;  %v1016_v13 = vadd.f32 %v1245_v11, %v1450_v40  ;;  %v597_v14 = vpop.f32.mrb[25].mxu0  ;;  %v725_v15 = vpop.f32.mrb[25].mxu1 }
 0x127   :  { %v982_v16 = vadd.f32 %v1450_v40, %v597_v14  ;;  %v1014_v17 = vadd.f32 %v1450_v40, %v725_v15  ;;  %v1214_v18 = vpop.f32.mrb[26].mxu0  ;;  %v1246_v19 = vpop.f32.mrb[26].mxu1 }
 0x128   :  { %1048 = vst [vmem:[%s1711_s3 + $0xd0] sm:$0xff] %v984_v12  ;;  %1080 = vst [vmem:[%s1711_s3 + $0x1d0] sm:$0xff] %v1016_v13  ;;  %v985_v20 = vadd.f32 %v1214_v18, %v1450_v40  ;;  %v1017_v21 = vadd.f32 %v1246_v19, %v1450_v40  ;;  %v600_v22 = vpop.f32.mrb[27].mxu0  ;;  %v728_v23 = vpop.f32.mrb[27].mxu1 }
 0x129   :  { %1046 = vst [vmem:[%s1711_s3 + $0xc0] sm:$0xff] %v982_v16  ;;  %1078 = vst [vmem:[%s1711_s3 + $0x1c0] sm:$0xff] %v1014_v17  ;;  %v983_v24 = vadd.f32 %v1450_v40, %v600_v22  ;;  %v1015_v25 = vadd.f32 %v1450_v40, %v728_v23 }
 0x12a   :  { %1049 = vst [vmem:[%s1711_s3 + $0xd8] sm:$0xff] %v985_v20  ;;  %1081 = vst [vmem:[%s1711_s3 + $0x1d8] sm:$0xff] %v1017_v21 }
 0x12b   :  { %1047 = vst [vmem:[%s1711_s3 + $0xc8] sm:$0xff] %v983_v24  ;;  %1079 = vst [vmem:[%s1711_s3 + $0x1c8] sm:$0xff] %v1015_v25 }
 0x12d   :  { %v1217_v26 = vpop.f32.mrb[28].mxu0  ;;  %v1249_v27 = vpop.f32.mrb[28].mxu1 }
 0x12e   :  { %v988_v28 = vadd.f32 %v1217_v26, %v1450_v40  ;;  %v1020_v29 = vadd.f32 %v1249_v27, %v1450_v40  ;;  %v613_v30 = vpop.f32.mrb[29].mxu0  ;;  %v741_v31 = vpop.f32.mrb[29].mxu1 }
 0x12f   :  { %v986_v32 = vadd.f32 %v1450_v40, %v613_v30  ;;  %v1018_v33 = vadd.f32 %v1450_v40, %v741_v31  ;;  %v1218_v34 = vpop.f32.mrb[30].mxu0  ;;  %v1250_v35 = vpop.f32.mrb[30].mxu1 }
 0x130   :  { %1052 = vst [vmem:[%s1711_s3 + $0xf0] sm:$0xff] %v988_v28  ;;  %1084 = vst [vmem:[%s1711_s3 + $0x1f0] sm:$0xff] %v1020_v29  ;;  %v989_v36 = vadd.f32 %v1218_v34, %v1450_v40  ;;  %v1021_v37 = vadd.f32 %v1250_v35, %v1450_v40  ;;  %v616_v38 = vpop.f32.mrb[31].mxu0  ;;  %v744_v39 = vpop.f32.mrb[31].mxu1 }
 0x131   :  { %1050 = vst [vmem:[%s1711_s3 + $0xe0] sm:$0xff] %v986_v32  ;;  %1082 = vst [vmem:[%s1711_s3 + $0x1e0] sm:$0xff] %v1018_v33  ;;  %v987_v41 = vadd.f32 %v1450_v40, %v616_v38  ;;  %v1019_v42 = vadd.f32 %v1450_v40, %v744_v39 }
 0x132   :  { %1053 = vst [vmem:[%s1711_s3 + $0xf8] sm:$0xff] %v989_v36  ;;  %1085 = vst [vmem:[%s1711_s3 + $0x1f8] sm:$0xff] %v1021_v37 }
 0x133   :  { %1051 = vst [vmem:[%s1711_s3 + $0xe8] sm:$0xff] %v987_v41  ;;  %1083 = vst [vmem:[%s1711_s3 + $0x1e8] sm:$0xff] %v1019_v42 }

// kernel: _forward.4
= control target key start
LH: loop header
LB: loop body
LE: loop exit
PB: predicated region body
PF: predicated region fallthrough
CT: control target
= control target key end

     0   :  { %s804_s1 = inlined_call_operand.vmem [shape: bf16[256,128], index: 1, kind: input, shape index: {}]   ;;  %s805_s0 = inlined_call_operand.vmem [shape: bf16[128,256], index: 0, kind: input, shape index: {}]   ;;  %s806_s2 = inlined_call_operand.vmem [shape: f32[1,128], index: 2, kind: input, shape index: {}]   ;;  %s807_s3 = inlined_call_operand.vmem [shape: f32[128,128], index: 3, kind: output, shape index: {}]  }
   0x1   :  { %v579_v0 = vld [vmem:[%s804_s1 + $0x40] sm:$0xff]   ;;  %v581_v2 = vld [vmem:[%s804_s1 + $0x48] sm:$0xff]   ;;  %v583_v4 = vld [vmem:[%s804_s1 + $0x50] sm:$0xff]  }
   0x2   :  { %v580_v1 = vld [vmem:[%s804_s1] sm:$0xff]   ;;  %499 = vmatprep.subr.bf16.mxu0 %v579_v0  ;;  %563 = vmatprep.subr.bf16.mxu1 %v579_v0  ;;  %v582_v3 = vld [vmem:[%s804_s1 + $0x8] sm:$0xff]   ;;  %v584_v5 = vld [vmem:[%s804_s1 + $0x10] sm:$0xff]  }
   0x3   :  { %500 = vmatpush3.bf16.msra.mxu0 %v580_v1  ;;  %571 = vmatpush3.bf16.msra.mxu1 %v580_v1  ;;  %v585_v6 = vld [vmem:[%s804_s1 + $0x58] sm:$0xff]   ;;  %v587_v8 = vld [vmem:[%s804_s1 + $0x60] sm:$0xff]   ;;  %v589_v10 = vld [vmem:[%s804_s1 + $0x68] sm:$0xff]  }
   0x4   :  { %501 = vmatprep.subr.bf16.mxu0 %v581_v2  ;;  %564 = vmatprep.subr.bf16.mxu1 %v581_v2  ;;  %v586_v7 = vld [vmem:[%s804_s1 + $0x18] sm:$0xff]   ;;  %v588_v9 = vld [vmem:[%s804_s1 + $0x20] sm:$0xff]   ;;  %v590_v13 = vld [vmem:[%s804_s1 + $0x28] sm:$0xff]  }
   0x5   :  { %v597_v11 = vld [vmem:[%s805_s0 + $0x4] ss:$8 sps:$4 sm:$0xff]   ;;  %v591_v14 = vld [vmem:[%s804_s1 + $0x70] sm:$0xff]   ;;  %v593_v16 = vld [vmem:[%s804_s1 + $0x78] sm:$0xff]  }
   0x6   :  { %v600_v12 = vld [vmem:[%s805_s0 + $0x44] ss:$8 sps:$4 sm:$0xff]   ;;  %307 = vmatprep.mubr.bf16.mxu0 %v597_v11  ;;  %v592_v15 = vld [vmem:[%s804_s1 + $0x30] sm:$0xff]   ;;  %v594_v17 = vld [vmem:[%s804_s1 + $0x38] sm:$0xff]  }
   0x7   :  { %502 = vmatpush3.bf16.msra.mxu0 %v582_v3  ;;  %572 = vmatpush3.bf16.msra.mxu1 %v582_v3  ;;  %v595_v18 = vld [vmem:[%s805_s0] ss:$8 sps:$4 sm:$0xff]   ;;  %v601_v20 = vld [vmem:[%s805_s0 + $0x14] ss:$8 sps:$4 sm:$0xff]   ;;  %v605_v22 = vld [vmem:[%s805_s0 + $0x10] ss:$8 sps:$4 sm:$0xff]  }
   0x8   :  { %503 = vmatprep.subr.bf16.mxu0 %v583_v4  ;;  %565 = vmatprep.subr.bf16.mxu1 %v583_v4  ;;  %v598_v19 = vld [vmem:[%s805_s0 + $0x40] ss:$8 sps:$4 sm:$0xff]   ;;  %v603_v21 = vld [vmem:[%s805_s0 + $0x54] ss:$8 sps:$4 sm:$0xff]   ;;  %v606_v23 = vld [vmem:[%s805_s0 + $0x50] ss:$8 sps:$4 sm:$0xff]  }
   0x9   :  { %339 = vmatprep.mubr.bf16.mxu1 %v600_v12  ;;  %v607_v24 = vld [vmem:[%s805_s0 + $0x24] ss:$8 sps:$4 sm:$0xff]   ;;  %v611_v26 = vld [vmem:[%s805_s0 + $0x20] ss:$8 sps:$4 sm:$0xff]   ;;  %v613_v28 = vld [vmem:[%s805_s0 + $0x34] ss:$8 sps:$4 sm:$0xff]  }
   0xa   :  { %v609_v25 = vld [vmem:[%s805_s0 + $0x64] ss:$8 sps:$4 sm:$0xff]   ;;  %v612_v27 = vld [vmem:[%s805_s0 + $0x60] ss:$8 sps:$4 sm:$0xff]   ;;  %v615_v29 = vld [vmem:[%s805_s0 + $0x74] ss:$8 sps:$4 sm:$0xff]  }
   0xb   :  { %504 = vmatpush3.bf16.msra.mxu0 %v584_v5  ;;  %573 = vmatpush3.bf16.msra.mxu1 %v584_v5  ;;  %v617_v30 = vld [vmem:[%s805_s0 + $0x30] ss:$8 sps:$4 sm:$0xff]   ;;  %v738_v35 = vld [vmem:[%s806_s2] ss:$0 sm:$0xff] }
   0xc   :  { %505 = vmatprep.subr.bf16.mxu0 %v585_v6  ;;  %566 = vmatprep.subr.bf16.mxu1 %v585_v6  ;;  %v618_v31 = vld [vmem:[%s805_s0 + $0x70] ss:$8 sps:$4 sm:$0xff]  }
   0xf   :  { %506 = vmatpush3.bf16.msra.mxu0 %v586_v7  ;;  %574 = vmatpush3.bf16.msra.mxu1 %v586_v7 }
  0x10   :  { %507 = vmatprep.subr.bf16.mxu0 %v587_v8  ;;  %567 = vmatprep.subr.bf16.mxu1 %v587_v8 }
  0x13   :  { %508 = vmatpush3.bf16.msra.mxu0 %v588_v9  ;;  %575 = vmatpush3.bf16.msra.mxu1 %v588_v9 }
  0x14   :  { %509 = vmatprep.subr.bf16.mxu0 %v589_v10  ;;  %568 = vmatprep.subr.bf16.mxu1 %v589_v10 }
  0x17   :  { %510 = vmatpush3.bf16.msra.mxu0 %v590_v13  ;;  %576 = vmatpush3.bf16.msra.mxu1 %v590_v13 }
  0x18   :  { %511 = vmatprep.subr.bf16.mxu0 %v591_v14  ;;  %569 = vmatprep.subr.bf16.mxu1 %v591_v14 }
  0x1b   :  { %512 = vmatpush3.bf16.msra.mxu0 %v592_v15  ;;  %577 = vmatpush3.bf16.msra.mxu1 %v592_v15 }
  0x1c   :  { %513 = vmatprep.subr.bf16.mxu0 %v593_v16  ;;  %570 = vmatprep.subr.bf16.mxu1 %v593_v16 }
  0x1f   :  { %514 = vmatpush3.bf16.msra.mxu0 %v594_v17  ;;  %578 = vmatpush3.bf16.msra.mxu1 %v594_v17 }
  0x22   :  { %308 = vmatmul.mubr.bf16.vlgmr.msra.gmra.mrb[0].mxu0 %v595_v18  ;;  %340 = vmatmul.mubr.bf16.vlgmr.msra.gmra.mrb[0].mxu1 %v598_v19 }
  0x23   :  { %315 = vmatprep.mubr.bf16.mxu0 %v601_v20  ;;  %347 = vmatprep.mubr.bf16.mxu1 %v603_v21 }
  0x2a   :  { %316 = vmatmul.mubr.bf16.gmra.mrb[4].mxu0 %v605_v22  ;;  %348 = vmatmul.mubr.bf16.gmra.mrb[4].mxu1 %v606_v23 }
  0x2b   :  { %323 = vmatprep.mubr.bf16.mxu0 %v607_v24  ;;  %355 = vmatprep.mubr.bf16.mxu1 %v609_v25 }
  0x32   :  { %324 = vmatmul.mubr.bf16.gmra.mrb[8].mxu0 %v611_v26  ;;  %356 = vmatmul.mubr.bf16.gmra.mrb[8].mxu1 %v612_v27 }
  0x33   :  { %331 = vmatprep.mubr.bf16.mxu0 %v613_v28  ;;  %363 = vmatprep.mubr.bf16.mxu1 %v615_v29 }
  0x3a   :  { %332 = vmatmul.mubr.bf16.gmra.mrb[12].mxu0 %v617_v30  ;;  %364 = vmatmul.mubr.bf16.gmra.mrb[12].mxu1 %v618_v31 }
  0xf5   :  { %v515_v32 = vpop.f32.mrb[0].mxu0  ;;  %v539_v33 = vpop.f32.mrb[0].mxu1 }
  0xf6   :  { %v516_v34 = vpop.f32.mrb[1].mxu0  ;;  %v540_v36 = vpop.f32.mrb[1].mxu1 }
  0xf7   :  { %v517_v37 = vadd.f32 %v516_v34, %v515_v32  ;;  %v541_v38 = vadd.f32 %v540_v36, %v539_v33  ;;  %v518_v39 = vpop.f32.mrb[2].mxu0  ;;  %v542_v40 = vpop.f32.mrb[2].mxu1 }
  0xf8   :  { %v519_v41 = vpop.f32.mrb[3].mxu0  ;;  %v543_v42 = vpop.f32.mrb[3].mxu1 }
  0xf9   :  { %v430_v43 = vadd.f32 %v517_v37, %v738_v35  ;;  %v438_v44 = vadd.f32 %v541_v38, %v738_v35  ;;  %v520_v45 = vadd.f32 %v519_v41, %v518_v39  ;;  %v544_v46 = vadd.f32 %v543_v42, %v542_v40 }
  0xfb   :  { %446 = vst [vmem:[%s807_s3] sm:$0xff] %v430_v43  ;;  %454 = vst [vmem:[%s807_s3 + $0x40] sm:$0xff] %v438_v44  ;;  %v431_v47 = vadd.f32 %v520_v45, %v738_v35  ;;  %v439_v48 = vadd.f32 %v544_v46, %v738_v35 }
  0xfd   :  { %447 = vst [vmem:[%s807_s3 + $0x8] sm:$0xff] %v431_v47  ;;  %455 = vst [vmem:[%s807_s3 + $0x48] sm:$0xff] %v439_v48  ;;  %v521_v49 = vpop.f32.mrb[4].mxu0  ;;  %v545_v50 = vpop.f32.mrb[4].mxu1 }
  0xfe   :  { %v522_v51 = vpop.f32.mrb[5].mxu0  ;;  %v546_v52 = vpop.f32.mrb[5].mxu1 }
  0xff   :  { %v523_v53 = vadd.f32 %v522_v51, %v521_v49  ;;  %v547_v54 = vadd.f32 %v546_v52, %v545_v50  ;;  %v524_v55 = vpop.f32.mrb[6].mxu0  ;;  %v548_v56 = vpop.f32.mrb[6].mxu1 }
 0x100   :  { %v525_v57 = vpop.f32.mrb[7].mxu0  ;;  %v549_v58 = vpop.f32.mrb[7].mxu1 }
 0x101   :  { %v432_v59 = vadd.f32 %v523_v53, %v738_v35  ;;  %v440_v60 = vadd.f32 %v547_v54, %v738_v35  ;;  %v526_v61 = vadd.f32 %v525_v57, %v524_v55  ;;  %v550_v62 = vadd.f32 %v549_v58, %v548_v56 }
 0x103   :  { %448 = vst [vmem:[%s807_s3 + $0x10] sm:$0xff] %v432_v59  ;;  %456 = vst [vmem:[%s807_s3 + $0x50] sm:$0xff] %v440_v60  ;;  %v433_v63 = vadd.f32 %v526_v61, %v738_v35  ;;  %v441_v0 = vadd.f32 %v550_v62, %v738_v35 }
 0x105   :  { %449 = vst [vmem:[%s807_s3 + $0x18] sm:$0xff] %v433_v63  ;;  %457 = vst [vmem:[%s807_s3 + $0x58] sm:$0xff] %v441_v0  ;;  %v527_v1 = vpop.f32.mrb[8].mxu0  ;;  %v551_v2 = vpop.f32.mrb[8].mxu1 }
 0x106   :  { %v528_v3 = vpop.f32.mrb[9].mxu0  ;;  %v552_v4 = vpop.f32.mrb[9].mxu1 }
 0x107   :  { %v529_v5 = vadd.f32 %v528_v3, %v527_v1  ;;  %v553_v6 = vadd.f32 %v552_v4, %v551_v2  ;;  %v530_v7 = vpop.f32.mrb[10].mxu0  ;;  %v554_v8 = vpop.f32.mrb[10].mxu1 }
 0x108   :  { %v531_v9 = vpop.f32.mrb[11].mxu0  ;;  %v555_v10 = vpop.f32.mrb[11].mxu1 }
 0x109   :  { %v434_v11 = vadd.f32 %v529_v5, %v738_v35  ;;  %v442_v12 = vadd.f32 %v553_v6, %v738_v35  ;;  %v532_v13 = vadd.f32 %v531_v9, %v530_v7  ;;  %v556_v14 = vadd.f32 %v555_v10, %v554_v8 }
 0x10b   :  { %450 = vst [vmem:[%s807_s3 + $0x20] sm:$0xff] %v434_v11  ;;  %458 = vst [vmem:[%s807_s3 + $0x60] sm:$0xff] %v442_v12  ;;  %v435_v15 = vadd.f32 %v532_v13, %v738_v35  ;;  %v443_v16 = vadd.f32 %v556_v14, %v738_v35 }
 0x10d   :  { %451 = vst [vmem:[%s807_s3 + $0x28] sm:$0xff] %v435_v15  ;;  %459 = vst [vmem:[%s807_s3 + $0x68] sm:$0xff] %v443_v16  ;;  %v533_v17 = vpop.f32.mrb[12].mxu0  ;;  %v557_v18 = vpop.f32.mrb[12].mxu1 }
 0x10e   :  { %v534_v19 = vpop.f32.mrb[13].mxu0  ;;  %v558_v20 = vpop.f32.mrb[13].mxu1 }
 0x10f   :  { %v535_v21 = vadd.f32 %v534_v19, %v533_v17  ;;  %v559_v22 = vadd.f32 %v558_v20, %v557_v18  ;;  %v536_v23 = vpop.f32.mrb[14].mxu0  ;;  %v560_v24 = vpop.f32.mrb[14].mxu1 }
 0x110   :  { %v537_v25 = vpop.f32.mrb[15].mxu0  ;;  %v561_v26 = vpop.f32.mrb[15].mxu1 }
 0x111   :  { %v436_v27 = vadd.f32 %v535_v21, %v738_v35  ;;  %v444_v28 = vadd.f32 %v559_v22, %v738_v35  ;;  %v538_v29 = vadd.f32 %v537_v25, %v536_v23  ;;  %v562_v30 = vadd.f32 %v561_v26, %v560_v24 }
 0x113   :  { %452 = vst [vmem:[%s807_s3 + $0x30] sm:$0xff] %v436_v27  ;;  %460 = vst [vmem:[%s807_s3 + $0x70] sm:$0xff] %v444_v28  ;;  %v437_v31 = vadd.f32 %v538_v29, %v738_v35  ;;  %v445_v32 = vadd.f32 %v562_v30, %v738_v35 }
 0x115   :  { %453 = vst [vmem:[%s807_s3 + $0x38] sm:$0xff] %v437_v31  ;;  %461 = vst [vmem:[%s807_s3 + $0x78] sm:$0xff] %v445_v32 }

// kernel: _forward.5
= control target key start
LH: loop header
LB: loop body
LE: loop exit
PB: predicated region body
PF: predicated region fallthrough
CT: control target
= control target key end

     0   :  { %s3742_s0 = inlined_call_operand.vmem [shape: f32[16,2,8,2,128], index: 0, kind: input, shape index: {}, may-alias: {0,2}]   ;;  %s3743_s1 = inlined_call_operand.vmem [shape: f32[16,1,8,1,128], index: 1, kind: input, shape index: {}]   ;;  %s3744_s2 = inlined_call_operand.vmem [shape: f32[16,2,8,2,128], index: 2, kind: output, shape index: {}, may-alias: {0,2}]  }
   0x1   :  { %v1679_v0 = vld [vmem:[%s3743_s1] ss:$0 sm:$0xff]  ;;  %v1680_v2 = vld [vmem:[%s3743_s1 + $0x1] ss:$0 sm:$0xff]  ;;  %v140_v4 = vld [vmem:[%s3742_s0 + $0x2] sm:$0x3] }
   0x2   :  { %v139_v1 = vld [vmem:[%s3742_s0] sm:$0x3]  ;;  %v1681_v5 = vld [vmem:[%s3743_s1 + $0x2] ss:$0 sm:$0xff]  ;;  %v141_v6 = vld [vmem:[%s3742_s0 + $0x4] sm:$0x3]  ;;  %v1164_v7 = vadd.f32 %v1680_v2, %v140_v4 }
   0x3   :  { %v1163_v3 = vadd.f32 %v1679_v0, %v139_v1  ;;  %v1165_v8 = vadd.f32 %v1681_v5, %v141_v6  ;;  %v1682_v9 = vld [vmem:[%s3743_s1 + $0x3] ss:$0 sm:$0xff]  ;;  %v142_v10 = vld [vmem:[%s3742_s0 + $0x6] sm:$0x3]  ;;  %v1683_v11 = vld [vmem:[%s3743_s1 + $0x4] ss:$0 sm:$0xff] }
   0x4   :  { %v1166_v12 = vadd.f32 %v1682_v9, %v142_v10  ;;  %v1684_v14 = vld [vmem:[%s3743_s1 + $0x5] ss:$0 sm:$0xff]  ;;  %v1685_v18 = vld [vmem:[%s3743_s1 + $0x6] ss:$0 sm:$0xff]  ;;  %v1686_v20 = vld [vmem:[%s3743_s1 + $0x7] ss:$0 sm:$0xff] }
   0x5   :  { %1419 = vst [vmem:[%s3744_s2] sm:$0x3] %v1163_v3  ;;  %v1687_v40 = vld [vmem:[%s3743_s1 + $0x8] ss:$0 sm:$0xff]  ;;  %v1688_v42 = vld [vmem:[%s3743_s1 + $0x9] ss:$0 sm:$0xff] }
   0x6   :  { %v1689_v45 = vld [vmem:[%s3743_s1 + $0xa] ss:$0 sm:$0xff]  ;;  %v1690_v49 = vld [vmem:[%s3743_s1 + $0xb] ss:$0 sm:$0xff]  ;;  %v1691_v51 = vld [vmem:[%s3743_s1 + $0xc] ss:$0 sm:$0xff] }
   0x7   :  { %v1692_v54 = vld [vmem:[%s3743_s1 + $0xd] ss:$0 sm:$0xff]  ;;  %v1693_v58 = vld [vmem:[%s3743_s1 + $0xe] ss:$0 sm:$0xff]  ;;  %v1694_v60 = vld [vmem:[%s3743_s1 + $0xf] ss:$0 sm:$0xff] }
   0xc   :  { %v143_v13 = vld [vmem:[%s3742_s0 + $0x8] sm:$0x3]  ;;  %v144_v15 = vld [vmem:[%s3742_s0 + $0xa] sm:$0x3] }
   0xd   :  { %1420 = vst [vmem:[%s3744_s2 + $0x2] sm:$0x3] %v1164_v7  ;;  %1421 = vst [vmem:[%s3744_s2 + $0x4] sm:$0x3] %v1165_v8  ;;  %v1167_v16 = vadd.f32 %v1683_v11, %v143_v13  ;;  %v1168_v17 = vadd.f32 %v1684_v14, %v144_v15 }
  0x14   :  { %v145_v19 = vld [vmem:[%s3742_s0 + $0xc] sm:$0x3] }
  0x15   :  { %1422 = vst [vmem:[%s3744_s2 + $0x6] sm:$0x3] %v1166_v12  ;;  %v1169_v21 = vadd.f32 %v1685_v18, %v145_v19 }
  0x1c   :  { %v146_v22 = vld [vmem:[%s3742_s0 + $0xe] sm:$0x3]  ;;  %v147_v23 = vld [vmem:[%s3742_s0 + $0x10] sm:$0x3]  ;;  %v148_v24 = vld [vmem:[%s3742_s0 + $0x12] sm:$0x3] }
  0x1d   :  { %1423 = vst [vmem:[%s3744_s2 + $0x8] sm:$0x3] %v1167_v16  ;;  %1424 = vst [vmem:[%s3744_s2 + $0xa] sm:$0x3] %v1168_v17  ;;  %v1170_v25 = vadd.f32 %v1686_v20, %v146_v22  ;;  %v1171_v26 = vadd.f32 %v1679_v0, %v147_v23  ;;  %v1172_v27 = vadd.f32 %v1680_v2, %v148_v24  ;;  %v1695_v16 = vld [vmem:[%s3743_s1 + $0x10] ss:$0 sm:$0xff] }
  0x24   :  { %v149_v28 = vld [vmem:[%s3742_s0 + $0x14] sm:$0x3]  ;;  %v150_v29 = vld [vmem:[%s3742_s0 + $0x16] sm:$0x3]  ;;  %v151_v30 = vld [vmem:[%s3742_s0 + $0x18] sm:$0x3] }
  0x25   :  { %1425 = vst [vmem:[%s3744_s2 + $0xc] sm:$0x3] %v1169_v21  ;;  %v1173_v31 = vadd.f32 %v1681_v5, %v149_v28  ;;  %v1174_v32 = vadd.f32 %v1682_v9, %v150_v29  ;;  %v1175_v33 = vadd.f32 %v1683_v11, %v151_v30  ;;  %v1697_v21 = vld [vmem:[%s3743_s1 + $0x12] ss:$0 sm:$0xff]  ;;  %v1700_v30 = vld [vmem:[%s3743_s1 + $0x15] ss:$0 sm:$0xff] }
  0x2c   :  { %v152_v34 = vld [vmem:[%s3742_s0 + $0x1a] sm:$0x3]  ;;  %v153_v35 = vld [vmem:[%s3742_s0 + $0x1c] sm:$0x3]  ;;  %v154_v36 = vld [vmem:[%s3742_s0 + $0x1e] sm:$0x3] }
  0x2d   :  { %1426 = vst [vmem:[%s3744_s2 + $0xe] sm:$0x3] %v1170_v25  ;;  %1427 = vst [vmem:[%s3744_s2 + $0x10] sm:$0x3] %v1171_v26  ;;  %v1176_v37 = vadd.f32 %v1684_v14, %v152_v34  ;;  %v1177_v38 = vadd.f32 %v1685_v18, %v153_v35  ;;  %v1178_v39 = vadd.f32 %v1686_v20, %v154_v36  ;;  %v1696_v18 = vld [vmem:[%s3743_s1 + $0x11] ss:$0 sm:$0xff] }
  0x2e   :  { %1428 = vst [vmem:[%s3744_s2 + $0x12] sm:$0x3] %v1172_v27  ;;  %v1698_v25 = vld [vmem:[%s3743_s1 + $0x13] ss:$0 sm:$0xff]  ;;  %v1699_v27 = vld [vmem:[%s3743_s1 + $0x14] ss:$0 sm:$0xff] }
  0x2f   :  { %v1701_v34 = vld [vmem:[%s3743_s1 + $0x16] ss:$0 sm:$0xff]  ;;  %v1702_v36 = vld [vmem:[%s3743_s1 + $0x17] ss:$0 sm:$0xff] }
  0x35   :  { %v155_v41 = vld [vmem:[%s3742_s0 + $0x20] sm:$0x3] }
  0x36   :  { %1429 = vst [vmem:[%s3744_s2 + $0x14] sm:$0x3] %v1173_v31  ;;  %1430 = vst [vmem:[%s3744_s2 + $0x16] sm:$0x3] %v1174_v32  ;;  %v1179_v43 = vadd.f32 %v1687_v40, %v155_v41 }
  0x37   :  { %1431 = vst [vmem:[%s3744_s2 + $0x18] sm:$0x3] %v1175_v33 }
  0x3e   :  { %v156_v44 = vld [vmem:[%s3742_s0 + $0x22] sm:$0x3]  ;;  %v157_v46 = vld [vmem:[%s3742_s0 + $0x24] sm:$0x3] }
  0x3f   :  { %1432 = vst [vmem:[%s3744_s2 + $0x1a] sm:$0x3] %v1176_v37  ;;  %1433 = vst [vmem:[%s3744_s2 + $0x1c] sm:$0x3] %v1177_v38  ;;  %v1180_v47 = vadd.f32 %v1688_v42, %v156_v44  ;;  %v1181_v48 = vadd.f32 %v1689_v45, %v157_v46 }
  0x40   :  { %1434 = vst [vmem:[%s3744_s2 + $0x1e] sm:$0x3] %v1178_v39 }
  0x47   :  { %v158_v50 = vld [vmem:[%s3742_s0 + $0x26] sm:$0x3] }
  0x48   :  { %1435 = vst [vmem:[%s3744_s2 + $0x20] sm:$0x3] %v1179_v43  ;;  %v1182_v52 = vadd.f32 %v1690_v49, %v158_v50 }
  0x4f   :  { %v159_v53 = vld [vmem:[%s3742_s0 + $0x28] sm:$0x3]  ;;  %v160_v55 = vld [vmem:[%s3742_s0 + $0x2a] sm:$0x3] }
  0x50   :  { %1436 = vst [vmem:[%s3744_s2 + $0x22] sm:$0x3] %v1180_v47  ;;  %1437 = vst [vmem:[%s3744_s2 + $0x24] sm:$0x3] %v1181_v48  ;;  %v1183_v56 = vadd.f32 %v1691_v51, %v159_v53  ;;  %v1184_v57 = vadd.f32 %v1692_v54, %v160_v55 }
  0x57   :  { %v161_v59 = vld [vmem:[%s3742_s0 + $0x2c] sm:$0x3] }
  0x58   :  { %1438 = vst [vmem:[%s3744_s2 + $0x26] sm:$0x3] %v1182_v52  ;;  %v1185_v61 = vadd.f32 %v1693_v58, %v161_v59 }
  0x5f   :  { %v162_v62 = vld [vmem:[%s3742_s0 + $0x2e] sm:$0x3]  ;;  %v163_v63 = vld [vmem:[%s3742_s0 + $0x30] sm:$0x3]  ;;  %v164_v0 = vld [vmem:[%s3742_s0 + $0x32] sm:$0x3] }
  0x60   :  { %1439 = vst [vmem:[%s3744_s2 + $0x28] sm:$0x3] %v1183_v56  ;;  %1440 = vst [vmem:[%s3744_s2 + $0x2a] sm:$0x3] %v1184_v57  ;;  %v1186_v1 = vadd.f32 %v1694_v60, %v162_v62  ;;  %v1187_v2 = vadd.f32 %v1687_v40, %v163_v63  ;;  %v1188_v3 = vadd.f32 %v1688_v42, %v164_v0  ;;  %v1703_v56 = vld [vmem:[%s3743_s1 + $0x18] ss:$0 sm:$0xff] }
  0x67   :  { %v165_v4 = vld [vmem:[%s3742_s0 + $0x34] sm:$0x3]  ;;  %v166_v5 = vld [vmem:[%s3742_s0 + $0x36] sm:$0x3]  ;;  %v167_v6 = vld [vmem:[%s3742_s0 + $0x38] sm:$0x3] }
  0x68   :  { %1441 = vst [vmem:[%s3744_s2 + $0x2c] sm:$0x3] %v1185_v61  ;;  %v1189_v7 = vadd.f32 %v1689_v45, %v165_v4  ;;  %v1190_v8 = vadd.f32 %v1690_v49, %v166_v5  ;;  %v1191_v9 = vadd.f32 %v1691_v51, %v167_v6  ;;  %v1705_v61 = vld [vmem:[%s3743_s1 + $0x1a] ss:$0 sm:$0xff]  ;;  %v1708_v6 = vld [vmem:[%s3743_s1 + $0x1d] ss:$0 sm:$0xff] }
  0x6f   :  { %v168_v10 = vld [vmem:[%s3742_s0 + $0x3a] sm:$0x3]  ;;  %v169_v11 = vld [vmem:[%s3742_s0 + $0x3c] sm:$0x3]  ;;  %v170_v12 = vld [vmem:[%s3742_s0 + $0x3e] sm:$0x3] }
  0x70   :  { %1442 = vst [vmem:[%s3744_s2 + $0x2e] sm:$0x3] %v1186_v1  ;;  %1443 = vst [vmem:[%s3744_s2 + $0x30] sm:$0x3] %v1187_v2  ;;  %v1192_v13 = vadd.f32 %v1692_v54, %v168_v10  ;;  %v1193_v14 = vadd.f32 %v1693_v58, %v169_v11  ;;  %v1194_v15 = vadd.f32 %v1694_v60, %v170_v12  ;;  %v1704_v58 = vld [vmem:[%s3743_s1 + $0x19] ss:$0 sm:$0xff] }
  0x71   :  { %1444 = vst [vmem:[%s3744_s2 + $0x32] sm:$0x3] %v1188_v3  ;;  %v1706_v1 = vld [vmem:[%s3743_s1 + $0x1b] ss:$0 sm:$0xff]  ;;  %v1707_v3 = vld [vmem:[%s3743_s1 + $0x1c] ss:$0 sm:$0xff] }
  0x72   :  { %v1709_v10 = vld [vmem:[%s3743_s1 + $0x1e] ss:$0 sm:$0xff]  ;;  %v1710_v12 = vld [vmem:[%s3743_s1 + $0x1f] ss:$0 sm:$0xff] }
  0x78   :  { %v171_v17 = vld [vmem:[%s3742_s0 + $0x40] sm:$0x3] }
  0x79   :  { %1445 = vst [vmem:[%s3744_s2 + $0x34] sm:$0x3] %v1189_v7  ;;  %1446 = vst [vmem:[%s3744_s2 + $0x36] sm:$0x3] %v1190_v8  ;;  %v1195_v19 = vadd.f32 %v1695_v16, %v171_v17 }
  0x7a   :  { %1447 = vst [vmem:[%s3744_s2 + $0x38] sm:$0x3] %v1191_v9 }
  0x81   :  { %v172_v20 = vld [vmem:[%s3742_s0 + $0x42] sm:$0x3]  ;;  %v173_v22 = vld [vmem:[%s3742_s0 + $0x44] sm:$0x3] }
  0x82   :  { %1448 = vst [vmem:[%s3744_s2 + $0x3a] sm:$0x3] %v1192_v13  ;;  %1449 = vst [vmem:[%s3744_s2 + $0x3c] sm:$0x3] %v1193_v14  ;;  %v1196_v23 = vadd.f32 %v1696_v18, %v172_v20  ;;  %v1197_v24 = vadd.f32 %v1697_v21, %v173_v22 }
  0x83   :  { %1450 = vst [vmem:[%s3744_s2 + $0x3e] sm:$0x3] %v1194_v15 }
  0x8a   :  { %v174_v26 = vld [vmem:[%s3742_s0 + $0x46] sm:$0x3] }
  0x8b   :  { %1451 = vst [vmem:[%s3744_s2 + $0x40] sm:$0x3] %v1195_v19  ;;  %v1198_v28 = vadd.f32 %v1698_v25, %v174_v26 }
  0x92   :  { %v175_v29 = vld [vmem:[%s3742_s0 + $0x48] sm:$0x3]  ;;  %v176_v31 = vld [vmem:[%s3742_s0 + $0x4a] sm:$0x3] }
  0x93   :  { %1452 = vst [vmem:[%s3744_s2 + $0x42] sm:$0x3] %v1196_v23  ;;  %1453 = vst [vmem:[%s3744_s2 + $0x44] sm:$0x3] %v1197_v24  ;;  %v1199_v32 = vadd.f32 %v1699_v27, %v175_v29  ;;  %v1200_v33 = vadd.f32 %v1700_v30, %v176_v31 }
  0x9a   :  { %v177_v35 = vld [vmem:[%s3742_s0 + $0x4c] sm:$0x3] }
  0x9b   :  { %1454 = vst [vmem:[%s3744_s2 + $0x46] sm:$0x3] %v1198_v28  ;;  %v1201_v37 = vadd.f32 %v1701_v34, %v177_v35 }
  0xa2   :  { %v178_v38 = vld [vmem:[%s3742_s0 + $0x4e] sm:$0x3]  ;;  %v179_v39 = vld [vmem:[%s3742_s0 + $0x50] sm:$0x3]  ;;  %v180_v40 = vld [vmem:[%s3742_s0 + $0x52] sm:$0x3] }
  0xa3   :  { %1455 = vst [vmem:[%s3744_s2 + $0x48] sm:$0x3] %v1199_v32  ;;  %1456 = vst [vmem:[%s3744_s2 + $0x4a] sm:$0x3] %v1200_v33  ;;  %v1202_v41 = vadd.f32 %v1702_v36, %v178_v38  ;;  %v1203_v42 = vadd.f32 %v1695_v16, %v179_v39  ;;  %v1204_v43 = vadd.f32 %v1696_v18, %v180_v40  ;;  %v1711_v32 = vld [vmem:[%s3743_s1 + $0x20] ss:$0 sm:$0xff] }
  0xaa   :  { %v181_v44 = vld [vmem:[%s3742_s0 + $0x54] sm:$0x3]  ;;  %v182_v45 = vld [vmem:[%s3742_s0 + $0x56] sm:$0x3]  ;;  %v183_v46 = vld [vmem:[%s3742_s0 + $0x58] sm:$0x3] }
  0xab   :  { %1457 = vst [vmem:[%s3744_s2 + $0x4c] sm:$0x3] %v1201_v37  ;;  %v1205_v47 = vadd.f32 %v1697_v21, %v181_v44  ;;  %v1206_v48 = vadd.f32 %v1698_v25, %v182_v45  ;;  %v1207_v49 = vadd.f32 %v1699_v27, %v183_v46  ;;  %v1713_v37 = vld [vmem:[%s3743_s1 + $0x22] ss:$0 sm:$0xff]  ;;  %v1716_v46 = vld [vmem:[%s3743_s1 + $0x25] ss:$0 sm:$0xff] }
  0xb2   :  { %v184_v50 = vld [vmem:[%s3742_s0 + $0x5a] sm:$0x3]  ;;  %v185_v51 = vld [vmem:[%s3742_s0 + $0x5c] sm:$0x3]  ;;  %v186_v52 = vld [vmem:[%s3742_s0 + $0x5e] sm:$0x3] }
  0xb3   :  { %1458 = vst [vmem:[%s3744_s2 + $0x4e] sm:$0x3] %v1202_v41  ;;  %1459 = vst [vmem:[%s3744_s2 + $0x50] sm:$0x3] %v1203_v42  ;;  %v1208_v53 = vadd.f32 %v1700_v30, %v184_v50  ;;  %v1209_v54 = vadd.f32 %v1701_v34, %v185_v51  ;;  %v1210_v55 = vadd.f32 %v1702_v36, %v186_v52  ;;  %v1712_v34 = vld [vmem:[%s3743_s1 + $0x21] ss:$0 sm:$0xff] }
  0xb4   :  { %1460 = vst [vmem:[%s3744_s2 + $0x52] sm:$0x3] %v1204_v43  ;;  %v1714_v41 = vld [vmem:[%s3743_s1 + $0x23] ss:$0 sm:$0xff]  ;;  %v1715_v43 = vld [vmem:[%s3743_s1 + $0x24] ss:$0 sm:$0xff] }
  0xb5   :  { %v1717_v50 = vld [vmem:[%s3743_s1 + $0x26] ss:$0 sm:$0xff]  ;;  %v1718_v52 = vld [vmem:[%s3743_s1 + $0x27] ss:$0 sm:$0xff] }
  0xbb   :  { %v187_v57 = vld [vmem:[%s3742_s0 + $0x60] sm:$0x3] }
  0xbc   :  { %1461 = vst [vmem:[%s3744_s2 + $0x54] sm:$0x3] %v1205_v47  ;;  %1462 = vst [vmem:[%s3744_s2 + $0x56] sm:$0x3] %v1206_v48  ;;  %v1211_v59 = vadd.f32 %v1703_v56, %v187_v57 }
  0xbd   :  { %1463 = vst [vmem:[%s3744_s2 + $0x58] sm:$0x3] %v1207_v49 }
  0xc4   :  { %v188_v60 = vld [vmem:[%s3742_s0 + $0x62] sm:$0x3]  ;;  %v189_v62 = vld [vmem:[%s3742_s0 + $0x64] sm:$0x3] }
  0xc5   :  { %1464 = vst [vmem:[%s3744_s2 + $0x5a] sm:$0x3] %v1208_v53  ;;  %1465 = vst [vmem:[%s3744_s2 + $0x5c] sm:$0x3] %v1209_v54  ;;  %v1212_v63 = vadd.f32 %v1704_v58, %v188_v60  ;;  %v1213_v0 = vadd.f32 %v1705_v61, %v189_v62 }
  0xc6   :  { %1466 = vst [vmem:[%s3744_s2 + $0x5e] sm:$0x3] %v1210_v55 }
  0xcd   :  { %v190_v2 = vld [vmem:[%s3742_s0 + $0x66] sm:$0x3] }
  0xce   :  { %1467 = vst [vmem:[%s3744_s2 + $0x60] sm:$0x3] %v1211_v59  ;;  %v1214_v4 = vadd.f32 %v1706_v1, %v190_v2 }
  0xd5   :  { %v191_v5 = vld [vmem:[%s3742_s0 + $0x68] sm:$0x3]  ;;  %v192_v7 = vld [vmem:[%s3742_s0 + $0x6a] sm:$0x3] }
  0xd6   :  { %1468 = vst [vmem:[%s3744_s2 + $0x62] sm:$0x3] %v1212_v63  ;;  %1469 = vst [vmem:[%s3744_s2 + $0x64] sm:$0x3] %v1213_v0  ;;  %v1215_v8 = vadd.f32 %v1707_v3, %v191_v5  ;;  %v1216_v9 = vadd.f32 %v1708_v6, %v192_v7 }
  0xdd   :  { %v193_v11 = vld [vmem:[%s3742_s0 + $0x6c] sm:$0x3] }
  0xde   :  { %1470 = vst [vmem:[%s3744_s2 + $0x66] sm:$0x3] %v1214_v4  ;;  %v1217_v13 = vadd.f32 %v1709_v10, %v193_v11 }
  0xe5   :  { %v194_v14 = vld [vmem:[%s3742_s0 + $0x6e] sm:$0x3]  ;;  %v195_v15 = vld [vmem:[%s3742_s0 + $0x70] sm:$0x3]  ;;  %v196_v16 = vld [vmem:[%s3742_s0 + $0x72] sm:$0x3] }
  0xe6   :  { %1471 = vst [vmem:[%s3744_s2 + $0x68] sm:$0x3] %v1215_v8  ;;  %1472 = vst [vmem:[%s3744_s2 + $0x6a] sm:$0x3] %v1216_v9  ;;  %v1218_v17 = vadd.f32 %v1710_v12, %v194_v14  ;;  %v1219_v18 = vadd.f32 %v1703_v56, %v195_v15  ;;  %v1220_v19 = vadd.f32 %v1704_v58, %v196_v16  ;;  %v1719_v8 = vld [vmem:[%s3743_s1 + $0x28] ss:$0 sm:$0xff] }
  0xed   :  { %v197_v20 = vld [vmem:[%s3742_s0 + $0x74] sm:$0x3]  ;;  %v198_v21 = vld [vmem:[%s3742_s0 + $0x76] sm:$0x3]  ;;  %v199_v22 = vld [vmem:[%s3742_s0 + $0x78] sm:$0x3] }
  0xee   :  { %1473 = vst [vmem:[%s3744_s2 + $0x6c] sm:$0x3] %v1217_v13  ;;  %v1221_v23 = vadd.f32 %v1705_v61, %v197_v20  ;;  %v1222_v24 = vadd.f32 %v1706_v1, %v198_v21  ;;  %v1223_v25 = vadd.f32 %v1707_v3, %v199_v22  ;;  %v1721_v13 = vld [vmem:[%s3743_s1 + $0x2a] ss:$0 sm:$0xff]  ;;  %v1724_v22 = vld [vmem:[%s3743_s1 + $0x2d] ss:$0 sm:$0xff] }
  0xf5   :  { %v200_v26 = vld [vmem:[%s3742_s0 + $0x7a] sm:$0x3]  ;;  %v201_v27 = vld [vmem:[%s3742_s0 + $0x7c] sm:$0x3]  ;;  %v202_v28 = vld [vmem:[%s3742_s0 + $0x7e] sm:$0x3] }
  0xf6   :  { %1474 = vst [vmem:[%s3744_s2 + $0x6e] sm:$0x3] %v1218_v17  ;;  %1475 = vst [vmem:[%s3744_s2 + $0x70] sm:$0x3] %v1219_v18  ;;  %v1224_v29 = vadd.f32 %v1708_v6, %v200_v26  ;;  %v1225_v30 = vadd.f32 %v1709_v10, %v201_v27  ;;  %v1226_v31 = vadd.f32 %v1710_v12, %v202_v28  ;;  %v1720_v10 = vld [vmem:[%s3743_s1 + $0x29] ss:$0 sm:$0xff] }
  0xf7   :  { %1476 = vst [vmem:[%s3744_s2 + $0x72] sm:$0x3] %v1220_v19  ;;  %v1722_v17 = vld [vmem:[%s3743_s1 + $0x2b] ss:$0 sm:$0xff]  ;;  %v1723_v19 = vld [vmem:[%s3743_s1 + $0x2c] ss:$0 sm:$0xff] }
  0xf8   :  { %v1725_v26 = vld [vmem:[%s3743_s1 + $0x2e] ss:$0 sm:$0xff]  ;;  %v1726_v28 = vld [vmem:[%s3743_s1 + $0x2f] ss:$0 sm:$0xff] }
  0xfe   :  { %v203_v33 = vld [vmem:[%s3742_s0 + $0x80] sm:$0x3] }
  0xff   :  { %1477 = vst [vmem:[%s3744_s2 + $0x74] sm:$0x3] %v1221_v23  ;;  %1478 = vst [vmem:[%s3744_s2 + $0x76] sm:$0x3] %v1222_v24  ;;  %v1227_v35 = vadd.f32 %v1711_v32, %v203_v33 }
 0x100   :  { %1479 = vst [vmem:[%s3744_s2 + $0x78] sm:$0x3] %v1223_v25 }
 0x107   :  { %v204_v36 = vld [vmem:[%s3742_s0 + $0x82] sm:$0x3]  ;;  %v205_v38 = vld [vmem:[%s3742_s0 + $0x84] sm:$0x3] }
 0x108   :  { %1480 = vst [vmem:[%s3744_s2 + $0x7a] sm:$0x3] %v1224_v29  ;;  %1481 = vst [vmem:[%s3744_s2 + $0x7c] sm:$0x3] %v1225_v30  ;;  %v1228_v39 = vadd.f32 %v1712_v34, %v204_v36  ;;  %v1229_v40 = vadd.f32 %v1713_v37, %v205_v38 }
 0x109   :  { %1482 = vst [vmem:[%s3744_s2 + $0x7e] sm:$0x3] %v1226_v31 }
 0x110   :  { %v206_v42 = vld [vmem:[%s3742_s0 + $0x86] sm:$0x3] }
 0x111   :  { %1483 = vst [vmem:[%s3744_s2 + $0x80] sm:$0x3] %v1227_v35  ;;  %v1230_v44 = vadd.f32 %v1714_v41, %v206_v42 }
 0x118   :  { %v207_v45 = vld [vmem:[%s3742_s0 + $0x88] sm:$0x3]  ;;  %v208_v47 = vld [vmem:[%s3742_s0 + $0x8a] sm:$0x3] }
 0x119   :  { %1484 = vst [vmem:[%s3744_s2 + $0x82] sm:$0x3] %v1228_v39  ;;  %1485 = vst [vmem:[%s3744_s2 + $0x84] sm:$0x3] %v1229_v40  ;;  %v1231_v48 = vadd.f32 %v1715_v43, %v207_v45  ;;  %v1232_v49 = vadd.f32 %v1716_v46, %v208_v47 }
 0x120   :  { %v209_v51 = vld [vmem:[%s3742_s0 + $0x8c] sm:$0x3] }
 0x121   :  { %1486 = vst [vmem:[%s3744_s2 + $0x86] sm:$0x3] %v1230_v44  ;;  %v1233_v53 = vadd.f32 %v1717_v50, %v209_v51 }
 0x128   :  { %v210_v54 = vld [vmem:[%s3742_s0 + $0x8e] sm:$0x3]  ;;  %v211_v55 = vld [vmem:[%s3742_s0 + $0x90] sm:$0x3]  ;;  %v212_v56 = vld [vmem:[%s3742_s0 + $0x92] sm:$0x3] }
 0x129   :  { %1487 = vst [vmem:[%s3744_s2 + $0x88] sm:$0x3] %v1231_v48  ;;  %1488 = vst [vmem:[%s3744_s2 + $0x8a] sm:$0x3] %v1232_v49  ;;  %v1234_v57 = vadd.f32 %v1718_v52, %v210_v54  ;;  %v1235_v58 = vadd.f32 %v1711_v32, %v211_v55  ;;  %v1236_v59 = vadd.f32 %v1712_v34, %v212_v56  ;;  %v1727_v48 = vld [vmem:[%s3743_s1 + $0x30] ss:$0 sm:$0xff] }
 0x130   :  { %v213_v60 = vld [vmem:[%s3742_s0 + $0x94] sm:$0x3]  ;;  %v214_v61 = vld [vmem:[%s3742_s0 + $0x96] sm:$0x3]  ;;  %v215_v62 = vld [vmem:[%s3742_s0 + $0x98] sm:$0x3] }
 0x131   :  { %1489 = vst [vmem:[%s3744_s2 + $0x8c] sm:$0x3] %v1233_v53  ;;  %v1237_v63 = vadd.f32 %v1713_v37, %v213_v60  ;;  %v1238_v0 = vadd.f32 %v1714_v41, %v214_v61  ;;  %v1239_v1 = vadd.f32 %v1715_v43, %v215_v62  ;;  %v1729_v53 = vld [vmem:[%s3743_s1 + $0x32] ss:$0 sm:$0xff]  ;;  %v1732_v62 = vld [vmem:[%s3743_s1 + $0x35] ss:$0 sm:$0xff] }
 0x138   :  { %v216_v2 = vld [vmem:[%s3742_s0 + $0x9a] sm:$0x3]  ;;  %v217_v3 = vld [vmem:[%s3742_s0 + $0x9c] sm:$0x3]  ;;  %v218_v4 = vld [vmem:[%s3742_s0 + $0x9e] sm:$0x3] }
 0x139   :  { %1490 = vst [vmem:[%s3744_s2 + $0x8e] sm:$0x3] %v1234_v57  ;;  %1491 = vst [vmem:[%s3744_s2 + $0x90] sm:$0x3] %v1235_v58  ;;  %v1240_v5 = vadd.f32 %v1716_v46, %v216_v2  ;;  %v1241_v6 = vadd.f32 %v1717_v50, %v217_v3  ;;  %v1242_v7 = vadd.f32 %v1718_v52, %v218_v4  ;;  %v1728_v50 = vld [vmem:[%s3743_s1 + $0x31] ss:$0 sm:$0xff] }
 0x13a   :  { %1492 = vst [vmem:[%s3744_s2 + $0x92] sm:$0x3] %v1236_v59  ;;  %v1730_v57 = vld [vmem:[%s3743_s1 + $0x33] ss:$0 sm:$0xff]  ;;  %v1731_v59 = vld [vmem:[%s3743_s1 + $0x34] ss:$0 sm:$0xff] }
 0x13b   :  { %v1733_v2 = vld [vmem:[%s3743_s1 + $0x36] ss:$0 sm:$0xff]  ;;  %v1734_v4 = vld [vmem:[%s3743_s1 + $0x37] ss:$0 sm:$0xff] }
 0x141   :  { %v219_v9 = vld [vmem:[%s3742_s0 + $0xa0] sm:$0x3] }
 0x142   :  { %1493 = vst [vmem:[%s3744_s2 + $0x94] sm:$0x3] %v1237_v63  ;;  %1494 = vst [vmem:[%s3744_s2 + $0x96] sm:$0x3] %v1238_v0  ;;  %v1243_v11 = vadd.f32 %v1719_v8, %v219_v9 }
 0x143   :  { %1495 = vst [vmem:[%s3744_s2 + $0x98] sm:$0x3] %v1239_v1 }
 0x14a   :  { %v220_v12 = vld [vmem:[%s3742_s0 + $0xa2] sm:$0x3]  ;;  %v221_v14 = vld [vmem:[%s3742_s0 + $0xa4] sm:$0x3] }
 0x14b   :  { %1496 = vst [vmem:[%s3744_s2 + $0x9a] sm:$0x3] %v1240_v5  ;;  %1497 = vst [vmem:[%s3744_s2 + $0x9c] sm:$0x3] %v1241_v6  ;;  %v1244_v15 = vadd.f32 %v1720_v10, %v220_v12  ;;  %v1245_v16 = vadd.f32 %v1721_v13, %v221_v14 }
 0x14c   :  { %1498 = vst [vmem:[%s3744_s2 + $0x9e] sm:$0x3] %v1242_v7 }
 0x153   :  { %v222_v18 = vld [vmem:[%s3742_s0 + $0xa6] sm:$0x3] }
 0x154   :  { %1499 = vst [vmem:[%s3744_s2 + $0xa0] sm:$0x3] %v1243_v11  ;;  %v1246_v20 = vadd.f32 %v1722_v17, %v222_v18 }
 0x15b   :  { %v223_v21 = vld [vmem:[%s3742_s0 + $0xa8] sm:$0x3]  ;;  %v224_v23 = vld [vmem:[%s3742_s0 + $0xaa] sm:$0x3] }
 0x15c   :  { %1500 = vst [vmem:[%s3744_s2 + $0xa2] sm:$0x3] %v1244_v15  ;;  %1501 = vst [vmem:[%s3744_s2 + $0xa4] sm:$0x3] %v1245_v16  ;;  %v1247_v24 = vadd.f32 %v1723_v19, %v223_v21  ;;  %v1248_v25 = vadd.f32 %v1724_v22, %v224_v23 }
 0x163   :  { %v225_v27 = vld [vmem:[%s3742_s0 + $0xac] sm:$0x3] }
 0x164   :  { %1502 = vst [vmem:[%s3744_s2 + $0xa6] sm:$0x3] %v1246_v20  ;;  %v1249_v29 = vadd.f32 %v1725_v26, %v225_v27 }
 0x16b   :  { %v226_v30 = vld [vmem:[%s3742_s0 + $0xae] sm:$0x3]  ;;  %v227_v31 = vld [vmem:[%s3742_s0 + $0xb0] sm:$0x3]  ;;  %v228_v32 = vld [vmem:[%s3742_s0 + $0xb2] sm:$0x3] }
 0x16c   :  { %1503 = vst [vmem:[%s3744_s2 + $0xa8] sm:$0x3] %v1247_v24  ;;  %1504 = vst [vmem:[%s3744_s2 + $0xaa] sm:$0x3] %v1248_v25  ;;  %v1250_v33 = vadd.f32 %v1726_v28, %v226_v30  ;;  %v1251_v34 = vadd.f32 %v1719_v8, %v227_v31  ;;  %v1252_v35 = vadd.f32 %v1720_v10, %v228_v32  ;;  %v1735_v24 = vld [vmem:[%s3743_s1 + $0x38] ss:$0 sm:$0xff] }
 0x173   :  { %v229_v36 = vld [vmem:[%s3742_s0 + $0xb4] sm:$0x3]  ;;  %v230_v37 = vld [vmem:[%s3742_s0 + $0xb6] sm:$0x3]  ;;  %v231_v38 = vld [vmem:[%s3742_s0 + $0xb8] sm:$0x3] }
 0x174   :  { %1505 = vst [vmem:[%s3744_s2 + $0xac] sm:$0x3] %v1249_v29  ;;  %v1253_v39 = vadd.f32 %v1721_v13, %v229_v36  ;;  %v1254_v40 = vadd.f32 %v1722_v17, %v230_v37  ;;  %v1255_v41 = vadd.f32 %v1723_v19, %v231_v38  ;;  %v1737_v29 = vld [vmem:[%s3743_s1 + $0x3a] ss:$0 sm:$0xff]  ;;  %v1740_v38 = vld [vmem:[%s3743_s1 + $0x3d] ss:$0 sm:$0xff] }
 0x17b   :  { %v232_v42 = vld [vmem:[%s3742_s0 + $0xba] sm:$0x3]  ;;  %v233_v43 = vld [vmem:[%s3742_s0 + $0xbc] sm:$0x3]  ;;  %v234_v44 = vld [vmem:[%s3742_s0 + $0xbe] sm:$0x3] }
 0x17c   :  { %1506 = vst [vmem:[%s3744_s2 + $0xae] sm:$0x3] %v1250_v33  ;;  %1507 = vst [vmem:[%s3744_s2 + $0xb0] sm:$0x3] %v1251_v34  ;;  %v1256_v45 = vadd.f32 %v1724_v22, %v232_v42  ;;  %v1257_v46 = vadd.f32 %v1725_v26, %v233_v43  ;;  %v1258_v47 = vadd.f32 %v1726_v28, %v234_v44  ;;  %v1736_v26 = vld [vmem:[%s3743_s1 + $0x39] ss:$0 sm:$0xff] }
 0x17d   :  { %1508 = vst [vmem:[%s3744_s2 + $0xb2] sm:$0x3] %v1252_v35  ;;  %v1738_v33 = vld [vmem:[%s3743_s1 + $0x3b] ss:$0 sm:$0xff]  ;;  %v1739_v35 = vld [vmem:[%s3743_s1 + $0x3c] ss:$0 sm:$0xff] }
 0x17e   :  { %v1741_v42 = vld [vmem:[%s3743_s1 + $0x3e] ss:$0 sm:$0xff]  ;;  %v1742_v44 = vld [vmem:[%s3743_s1 + $0x3f] ss:$0 sm:$0xff] }
 0x184   :  { %v235_v49 = vld [vmem:[%s3742_s0 + $0xc0] sm:$0x3] }
 0x185   :  { %1509 = vst [vmem:[%s3744_s2 + $0xb4] sm:$0x3] %v1253_v39  ;;  %1510 = vst [vmem:[%s3744_s2 + $0xb6] sm:$0x3] %v1254_v40  ;;  %v1259_v51 = vadd.f32 %v1727_v48, %v235_v49 }
 0x186   :  { %1511 = vst [vmem:[%s3744_s2 + $0xb8] sm:$0x3] %v1255_v41 }
 0x18d   :  { %v236_v52 = vld [vmem:[%s3742_s0 + $0xc2] sm:$0x3]  ;;  %v237_v54 = vld [vmem:[%s3742_s0 + $0xc4] sm:$0x3] }
 0x18e   :  { %1512 = vst [vmem:[%s3744_s2 + $0xba] sm:$0x3] %v1256_v45  ;;  %1513 = vst [vmem:[%s3744_s2 + $0xbc] sm:$0x3] %v1257_v46  ;;  %v1260_v55 = vadd.f32 %v1728_v50, %v236_v52  ;;  %v1261_v56 = vadd.f32 %v1729_v53, %v237_v54 }
 0x18f   :  { %1514 = vst [vmem:[%s3744_s2 + $0xbe] sm:$0x3] %v1258_v47 }
 0x196   :  { %v238_v58 = vld [vmem:[%s3742_s0 + $0xc6] sm:$0x3] }
 0x197   :  { %1515 = vst [vmem:[%s3744_s2 + $0xc0] sm:$0x3] %v1259_v51  ;;  %v1262_v60 = vadd.f32 %v1730_v57, %v238_v58 }
 0x19e   :  { %v239_v61 = vld [vmem:[%s3742_s0 + $0xc8] sm:$0x3]  ;;  %v240_v63 = vld [vmem:[%s3742_s0 + $0xca] sm:$0x3] }
 0x19f   :  { %1516 = vst [vmem:[%s3744_s2 + $0xc2] sm:$0x3] %v1260_v55  ;;  %1517 = vst [vmem:[%s3744_s2 + $0xc4] sm:$0x3] %v1261_v56  ;;  %v1263_v0 = vadd.f32 %v1731_v59, %v239_v61  ;;  %v1264_v1 = vadd.f32 %v1732_v62, %v240_v63 }
 0x1a6   :  { %v241_v3 = vld [vmem:[%s3742_s0 + $0xcc] sm:$0x3] }
 0x1a7   :  { %1518 = vst [vmem:[%s3744_s2 + $0xc6] sm:$0x3] %v1262_v60  ;;  %v1265_v5 = vadd.f32 %v1733_v2, %v241_v3 }
 0x1ae   :  { %v242_v6 = vld [vmem:[%s3742_s0 + $0xce] sm:$0x3]  ;;  %v243_v7 = vld [vmem:[%s3742_s0 + $0xd0] sm:$0x3]  ;;  %v244_v8 = vld [vmem:[%s3742_s0 + $0xd2] sm:$0x3] }
 0x1af   :  { %1519 = vst [vmem:[%s3744_s2 + $0xc8] sm:$0x3] %v1263_v0  ;;  %1520 = vst [vmem:[%s3744_s2 + $0xca] sm:$0x3] %v1264_v1  ;;  %v1266_v9 = vadd.f32 %v1734_v4, %v242_v6  ;;  %v1267_v10 = vadd.f32 %v1727_v48, %v243_v7  ;;  %v1268_v11 = vadd.f32 %v1728_v50, %v244_v8  ;;  %v1743_v0 = vld [vmem:[%s3743_s1 + $0x40] ss:$0 sm:$0xff] }
 0x1b6   :  { %v245_v12 = vld [vmem:[%s3742_s0 + $0xd4] sm:$0x3]  ;;  %v246_v13 = vld [vmem:[%s3742_s0 + $0xd6] sm:$0x3]  ;;  %v247_v14 = vld [vmem:[%s3742_s0 + $0xd8] sm:$0x3] }
 0x1b7   :  { %1521 = vst [vmem:[%s3744_s2 + $0xcc] sm:$0x3] %v1265_v5  ;;  %v1269_v15 = vadd.f32 %v1729_v53, %v245_v12  ;;  %v1270_v16 = vadd.f32 %v1730_v57, %v246_v13  ;;  %v1271_v17 = vadd.f32 %v1731_v59, %v247_v14  ;;  %v1745_v5 = vld [vmem:[%s3743_s1 + $0x42] ss:$0 sm:$0xff]  ;;  %v1748_v14 = vld [vmem:[%s3743_s1 + $0x45] ss:$0 sm:$0xff] }
 0x1be   :  { %v248_v18 = vld [vmem:[%s3742_s0 + $0xda] sm:$0x3]  ;;  %v249_v19 = vld [vmem:[%s3742_s0 + $0xdc] sm:$0x3]  ;;  %v250_v20 = vld [vmem:[%s3742_s0 + $0xde] sm:$0x3] }
 0x1bf   :  { %1522 = vst [vmem:[%s3744_s2 + $0xce] sm:$0x3] %v1266_v9  ;;  %1523 = vst [vmem:[%s3744_s2 + $0xd0] sm:$0x3] %v1267_v10  ;;  %v1272_v21 = vadd.f32 %v1732_v62, %v248_v18  ;;  %v1273_v22 = vadd.f32 %v1733_v2, %v249_v19  ;;  %v1274_v23 = vadd.f32 %v1734_v4, %v250_v20  ;;  %v1744_v2 = vld [vmem:[%s3743_s1 + $0x41] ss:$0 sm:$0xff] }
 0x1c0   :  { %1524 = vst [vmem:[%s3744_s2 + $0xd2] sm:$0x3] %v1268_v11  ;;  %v1746_v9 = vld [vmem:[%s3743_s1 + $0x43] ss:$0 sm:$0xff]  ;;  %v1747_v11 = vld [vmem:[%s3743_s1 + $0x44] ss:$0 sm:$0xff] }
 0x1c1   :  { %v1749_v18 = vld [vmem:[%s3743_s1 + $0x46] ss:$0 sm:$0xff]  ;;  %v1750_v20 = vld [vmem:[%s3743_s1 + $0x47] ss:$0 sm:$0xff] }
 0x1c7   :  { %v251_v25 = vld [vmem:[%s3742_s0 + $0xe0] sm:$0x3] }
 0x1c8   :  { %1525 = vst [vmem:[%s3744_s2 + $0xd4] sm:$0x3] %v1269_v15  ;;  %1526 = vst [vmem:[%s3744_s2 + $0xd6] sm:$0x3] %v1270_v16  ;;  %v1275_v27 = vadd.f32 %v1735_v24, %v251_v25 }
 0x1c9   :  { %1527 = vst [vmem:[%s3744_s2 + $0xd8] sm:$0x3] %v1271_v17 }
 0x1d0   :  { %v252_v28 = vld [vmem:[%s3742_s0 + $0xe2] sm:$0x3]  ;;  %v253_v30 = vld [vmem:[%s3742_s0 + $0xe4] sm:$0x3] }
 0x1d1   :  { %1528 = vst [vmem:[%s3744_s2 + $0xda] sm:$0x3] %v1272_v21  ;;  %1529 = vst [vmem:[%s3744_s2 + $0xdc] sm:$0x3] %v1273_v22  ;;  %v1276_v31 = vadd.f32 %v1736_v26, %v252_v28  ;;  %v1277_v32 = vadd.f32 %v1737_v29, %v253_v30 }
 0x1d2   :  { %1530 = vst [vmem:[%s3744_s2 + $0xde] sm:$0x3] %v1274_v23 }
 0x1d9   :  { %v254_v34 = vld [vmem:[%s3742_s0 + $0xe6] sm:$0x3] }
 0x1da   :  { %1531 = vst [vmem:[%s3744_s2 + $0xe0] sm:$0x3] %v1275_v27  ;;  %v1278_v36 = vadd.f32 %v1738_v33, %v254_v34 }
 0x1e1   :  { %v255_v37 = vld [vmem:[%s3742_s0 + $0xe8] sm:$0x3]  ;;  %v256_v39 = vld [vmem:[%s3742_s0 + $0xea] sm:$0x3] }
 0x1e2   :  { %1532 = vst [vmem:[%s3744_s2 + $0xe2] sm:$0x3] %v1276_v31  ;;  %1533 = vst [vmem:[%s3744_s2 + $0xe4] sm:$0x3] %v1277_v32  ;;  %v1279_v40 = vadd.f32 %v1739_v35, %v255_v37  ;;  %v1280_v41 = vadd.f32 %v1740_v38, %v256_v39 }
 0x1e9   :  { %v257_v43 = vld [vmem:[%s3742_s0 + $0xec] sm:$0x3] }
 0x1ea   :  { %1534 = vst [vmem:[%s3744_s2 + $0xe6] sm:$0x3] %v1278_v36  ;;  %v1281_v45 = vadd.f32 %v1741_v42, %v257_v43 }
 0x1f1   :  { %v258_v46 = vld [vmem:[%s3742_s0 + $0xee] sm:$0x3]  ;;  %v259_v47 = vld [vmem:[%s3742_s0 + $0xf0] sm:$0x3]  ;;  %v260_v48 = vld [vmem:[%s3742_s0 + $0xf2] sm:$0x3] }
 0x1f2   :  { %1535 = vst [vmem:[%s3744_s2 + $0xe8] sm:$0x3] %v1279_v40  ;;  %1536 = vst [vmem:[%s3744_s2 + $0xea] sm:$0x3] %v1280_v41  ;;  %v1282_v49 = vadd.f32 %v1742_v44, %v258_v46  ;;  %v1283_v50 = vadd.f32 %v1735_v24, %v259_v47  ;;  %v1284_v51 = vadd.f32 %v1736_v26, %v260_v48  ;;  %v1751_v40 = vld [vmem:[%s3743_s1 + $0x48] ss:$0 sm:$0xff] }
 0x1f9   :  { %v261_v52 = vld [vmem:[%s3742_s0 + $0xf4] sm:$0x3]  ;;  %v262_v53 = vld [vmem:[%s3742_s0 + $0xf6] sm:$0x3]  ;;  %v263_v54 = vld [vmem:[%s3742_s0 + $0xf8] sm:$0x3] }
 0x1fa   :  { %1537 = vst [vmem:[%s3744_s2 + $0xec] sm:$0x3] %v1281_v45  ;;  %v1285_v55 = vadd.f32 %v1737_v29, %v261_v52  ;;  %v1286_v56 = vadd.f32 %v1738_v33, %v262_v53  ;;  %v1287_v57 = vadd.f32 %v1739_v35, %v263_v54  ;;  %v1753_v45 = vld [vmem:[%s3743_s1 + $0x4a] ss:$0 sm:$0xff]  ;;  %v1756_v54 = vld [vmem:[%s3743_s1 + $0x4d] ss:$0 sm:$0xff] }
 0x201   :  { %v264_v58 = vld [vmem:[%s3742_s0 + $0xfa] sm:$0x3]  ;;  %v265_v59 = vld [vmem:[%s3742_s0 + $0xfc] sm:$0x3]  ;;  %v266_v60 = vld [vmem:[%s3742_s0 + $0xfe] sm:$0x3] }
 0x202   :  { %1538 = vst [vmem:[%s3744_s2 + $0xee] sm:$0x3] %v1282_v49  ;;  %1539 = vst [vmem:[%s3744_s2 + $0xf0] sm:$0x3] %v1283_v50  ;;  %v1288_v61 = vadd.f32 %v1740_v38, %v264_v58  ;;  %v1289_v62 = vadd.f32 %v1741_v42, %v265_v59  ;;  %v1290_v63 = vadd.f32 %v1742_v44, %v266_v60  ;;  %v1752_v42 = vld [vmem:[%s3743_s1 + $0x49] ss:$0 sm:$0xff] }
 0x203   :  { %1540 = vst [vmem:[%s3744_s2 + $0xf2] sm:$0x3] %v1284_v51  ;;  %v1754_v49 = vld [vmem:[%s3743_s1 + $0x4b] ss:$0 sm:$0xff]  ;;  %v1755_v51 = vld [vmem:[%s3743_s1 + $0x4c] ss:$0 sm:$0xff] }
 0x204   :  { %v1757_v58 = vld [vmem:[%s3743_s1 + $0x4e] ss:$0 sm:$0xff]  ;;  %v1758_v60 = vld [vmem:[%s3743_s1 + $0x4f] ss:$0 sm:$0xff] }
 0x20a   :  { %v267_v1 = vld [vmem:[%s3742_s0 + $0x100] sm:$0x3] }
 0x20b   :  { %1541 = vst [vmem:[%s3744_s2 + $0xf4] sm:$0x3] %v1285_v55  ;;  %1542 = vst [vmem:[%s3744_s2 + $0xf6] sm:$0x3] %v1286_v56  ;;  %v1291_v3 = vadd.f32 %v1743_v0, %v267_v1 }
 0x20c   :  { %1543 = vst [vmem:[%s3744_s2 + $0xf8] sm:$0x3] %v1287_v57 }
 0x213   :  { %v268_v4 = vld [vmem:[%s3742_s0 + $0x102] sm:$0x3]  ;;  %v269_v6 = vld [vmem:[%s3742_s0 + $0x104] sm:$0x3] }
 0x214   :  { %1544 = vst [vmem:[%s3744_s2 + $0xfa] sm:$0x3] %v1288_v61  ;;  %1545 = vst [vmem:[%s3744_s2 + $0xfc] sm:$0x3] %v1289_v62  ;;  %v1292_v7 = vadd.f32 %v1744_v2, %v268_v4  ;;  %v1293_v8 = vadd.f32 %v1745_v5, %v269_v6 }
 0x215   :  { %1546 = vst [vmem:[%s3744_s2 + $0xfe] sm:$0x3] %v1290_v63 }
 0x21c   :  { %v270_v10 = vld [vmem:[%s3742_s0 + $0x106] sm:$0x3] }
 0x21d   :  { %1547 = vst [vmem:[%s3744_s2 + $0x100] sm:$0x3] %v1291_v3  ;;  %v1294_v12 = vadd.f32 %v1746_v9, %v270_v10 }
 0x224   :  { %v271_v13 = vld [vmem:[%s3742_s0 + $0x108] sm:$0x3]  ;;  %v272_v15 = vld [vmem:[%s3742_s0 + $0x10a] sm:$0x3] }
 0x225   :  { %1548 = vst [vmem:[%s3744_s2 + $0x102] sm:$0x3] %v1292_v7  ;;  %1549 = vst [vmem:[%s3744_s2 + $0x104] sm:$0x3] %v1293_v8  ;;  %v1295_v16 = vadd.f32 %v1747_v11, %v271_v13  ;;  %v1296_v17 = vadd.f32 %v1748_v14, %v272_v15 }
 0x22c   :  { %v273_v19 = vld [vmem:[%s3742_s0 + $0x10c] sm:$0x3] }
 0x22d   :  { %1550 = vst [vmem:[%s3744_s2 + $0x106] sm:$0x3] %v1294_v12  ;;  %v1297_v21 = vadd.f32 %v1749_v18, %v273_v19 }
 0x234   :  { %v274_v22 = vld [vmem:[%s3742_s0 + $0x10e] sm:$0x3]  ;;  %v275_v23 = vld [vmem:[%s3742_s0 + $0x110] sm:$0x3]  ;;  %v276_v24 = vld [vmem:[%s3742_s0 + $0x112] sm:$0x3] }
 0x235   :  { %1551 = vst [vmem:[%s3744_s2 + $0x108] sm:$0x3] %v1295_v16  ;;  %1552 = vst [vmem:[%s3744_s2 + $0x10a] sm:$0x3] %v1296_v17  ;;  %v1298_v25 = vadd.f32 %v1750_v20, %v274_v22  ;;  %v1299_v26 = vadd.f32 %v1743_v0, %v275_v23  ;;  %v1300_v27 = vadd.f32 %v1744_v2, %v276_v24  ;;  %v1759_v16 = vld [vmem:[%s3743_s1 + $0x50] ss:$0 sm:$0xff] }
 0x23c   :  { %v277_v28 = vld [vmem:[%s3742_s0 + $0x114] sm:$0x3]  ;;  %v278_v29 = vld [vmem:[%s3742_s0 + $0x116] sm:$0x3]  ;;  %v279_v30 = vld [vmem:[%s3742_s0 + $0x118] sm:$0x3] }
 0x23d   :  { %1553 = vst [vmem:[%s3744_s2 + $0x10c] sm:$0x3] %v1297_v21  ;;  %v1301_v31 = vadd.f32 %v1745_v5, %v277_v28  ;;  %v1302_v32 = vadd.f32 %v1746_v9, %v278_v29  ;;  %v1303_v33 = vadd.f32 %v1747_v11, %v279_v30  ;;  %v1761_v21 = vld [vmem:[%s3743_s1 + $0x52] ss:$0 sm:$0xff]  ;;  %v1764_v30 = vld [vmem:[%s3743_s1 + $0x55] ss:$0 sm:$0xff] }
 0x244   :  { %v280_v34 = vld [vmem:[%s3742_s0 + $0x11a] sm:$0x3]  ;;  %v281_v35 = vld [vmem:[%s3742_s0 + $0x11c] sm:$0x3]  ;;  %v282_v36 = vld [vmem:[%s3742_s0 + $0x11e] sm:$0x3] }
 0x245   :  { %1554 = vst [vmem:[%s3744_s2 + $0x10e] sm:$0x3] %v1298_v25  ;;  %1555 = vst [vmem:[%s3744_s2 + $0x110] sm:$0x3] %v1299_v26  ;;  %v1304_v37 = vadd.f32 %v1748_v14, %v280_v34  ;;  %v1305_v38 = vadd.f32 %v1749_v18, %v281_v35  ;;  %v1306_v39 = vadd.f32 %v1750_v20, %v282_v36  ;;  %v1760_v18 = vld [vmem:[%s3743_s1 + $0x51] ss:$0 sm:$0xff] }
 0x246   :  { %1556 = vst [vmem:[%s3744_s2 + $0x112] sm:$0x3] %v1300_v27  ;;  %v1762_v25 = vld [vmem:[%s3743_s1 + $0x53] ss:$0 sm:$0xff]  ;;  %v1763_v27 = vld [vmem:[%s3743_s1 + $0x54] ss:$0 sm:$0xff] }
 0x247   :  { %v1765_v34 = vld [vmem:[%s3743_s1 + $0x56] ss:$0 sm:$0xff]  ;;  %v1766_v36 = vld [vmem:[%s3743_s1 + $0x57] ss:$0 sm:$0xff] }
 0x24d   :  { %v283_v41 = vld [vmem:[%s3742_s0 + $0x120] sm:$0x3] }
 0x24e   :  { %1557 = vst [vmem:[%s3744_s2 + $0x114] sm:$0x3] %v1301_v31  ;;  %1558 = vst [vmem:[%s3744_s2 + $0x116] sm:$0x3] %v1302_v32  ;;  %v1307_v43 = vadd.f32 %v1751_v40, %v283_v41 }
 0x24f   :  { %1559 = vst [vmem:[%s3744_s2 + $0x118] sm:$0x3] %v1303_v33 }
 0x256   :  { %v284_v44 = vld [vmem:[%s3742_s0 + $0x122] sm:$0x3]  ;;  %v285_v46 = vld [vmem:[%s3742_s0 + $0x124] sm:$0x3] }
 0x257   :  { %1560 = vst [vmem:[%s3744_s2 + $0x11a] sm:$0x3] %v1304_v37  ;;  %1561 = vst [vmem:[%s3744_s2 + $0x11c] sm:$0x3] %v1305_v38  ;;  %v1308_v47 = vadd.f32 %v1752_v42, %v284_v44  ;;  %v1309_v48 = vadd.f32 %v1753_v45, %v285_v46 }
 0x258   :  { %1562 = vst [vmem:[%s3744_s2 + $0x11e] sm:$0x3] %v1306_v39 }
 0x25f   :  { %v286_v50 = vld [vmem:[%s3742_s0 + $0x126] sm:$0x3] }
 0x260   :  { %1563 = vst [vmem:[%s3744_s2 + $0x120] sm:$0x3] %v1307_v43  ;;  %v1310_v52 = vadd.f32 %v1754_v49, %v286_v50 }
 0x267   :  { %v287_v53 = vld [vmem:[%s3742_s0 + $0x128] sm:$0x3]  ;;  %v288_v55 = vld [vmem:[%s3742_s0 + $0x12a] sm:$0x3] }
 0x268   :  { %1564 = vst [vmem:[%s3744_s2 + $0x122] sm:$0x3] %v1308_v47  ;;  %1565 = vst [vmem:[%s3744_s2 + $0x124] sm:$0x3] %v1309_v48  ;;  %v1311_v56 = vadd.f32 %v1755_v51, %v287_v53  ;;  %v1312_v57 = vadd.f32 %v1756_v54, %v288_v55 }
 0x26f   :  { %v289_v59 = vld [vmem:[%s3742_s0 + $0x12c] sm:$0x3] }
 0x270   :  { %1566 = vst [vmem:[%s3744_s2 + $0x126] sm:$0x3] %v1310_v52  ;;  %v1313_v61 = vadd.f32 %v1757_v58, %v289_v59 }
 0x277   :  { %v290_v62 = vld [vmem:[%s3742_s0 + $0x12e] sm:$0x3]  ;;  %v291_v63 = vld [vmem:[%s3742_s0 + $0x130] sm:$0x3]  ;;  %v292_v0 = vld [vmem:[%s3742_s0 + $0x132] sm:$0x3] }
 0x278   :  { %1567 = vst [vmem:[%s3744_s2 + $0x128] sm:$0x3] %v1311_v56  ;;  %1568 = vst [vmem:[%s3744_s2 + $0x12a] sm:$0x3] %v1312_v57  ;;  %v1314_v1 = vadd.f32 %v1758_v60, %v290_v62  ;;  %v1315_v2 = vadd.f32 %v1751_v40, %v291_v63  ;;  %v1316_v3 = vadd.f32 %v1752_v42, %v292_v0  ;;  %v1767_v56 = vld [vmem:[%s3743_s1 + $0x58] ss:$0 sm:$0xff] }
 0x27f   :  { %v293_v4 = vld [vmem:[%s3742_s0 + $0x134] sm:$0x3]  ;;  %v294_v5 = vld [vmem:[%s3742_s0 + $0x136] sm:$0x3]  ;;  %v295_v6 = vld [vmem:[%s3742_s0 + $0x138] sm:$0x3] }
 0x280   :  { %1569 = vst [vmem:[%s3744_s2 + $0x12c] sm:$0x3] %v1313_v61  ;;  %v1317_v7 = vadd.f32 %v1753_v45, %v293_v4  ;;  %v1318_v8 = vadd.f32 %v1754_v49, %v294_v5  ;;  %v1319_v9 = vadd.f32 %v1755_v51, %v295_v6  ;;  %v1769_v61 = vld [vmem:[%s3743_s1 + $0x5a] ss:$0 sm:$0xff]  ;;  %v1772_v6 = vld [vmem:[%s3743_s1 + $0x5d] ss:$0 sm:$0xff] }
 0x287   :  { %v296_v10 = vld [vmem:[%s3742_s0 + $0x13a] sm:$0x3]  ;;  %v297_v11 = vld [vmem:[%s3742_s0 + $0x13c] sm:$0x3]  ;;  %v298_v12 = vld [vmem:[%s3742_s0 + $0x13e] sm:$0x3] }
 0x288   :  { %1570 = vst [vmem:[%s3744_s2 + $0x12e] sm:$0x3] %v1314_v1  ;;  %1571 = vst [vmem:[%s3744_s2 + $0x130] sm:$0x3] %v1315_v2  ;;  %v1320_v13 = vadd.f32 %v1756_v54, %v296_v10  ;;  %v1321_v14 = vadd.f32 %v1757_v58, %v297_v11  ;;  %v1322_v15 = vadd.f32 %v1758_v60, %v298_v12  ;;  %v1768_v58 = vld [vmem:[%s3743_s1 + $0x59] ss:$0 sm:$0xff] }
 0x289   :  { %1572 = vst [vmem:[%s3744_s2 + $0x132] sm:$0x3] %v1316_v3  ;;  %v1770_v1 = vld [vmem:[%s3743_s1 + $0x5b] ss:$0 sm:$0xff]  ;;  %v1771_v3 = vld [vmem:[%s3743_s1 + $0x5c] ss:$0 sm:$0xff] }
 0x28a   :  { %v1773_v10 = vld [vmem:[%s3743_s1 + $0x5e] ss:$0 sm:$0xff]  ;;  %v1774_v12 = vld [vmem:[%s3743_s1 + $0x5f] ss:$0 sm:$0xff] }
 0x290   :  { %v299_v17 = vld [vmem:[%s3742_s0 + $0x140] sm:$0x3] }
 0x291   :  { %1573 = vst [vmem:[%s3744_s2 + $0x134] sm:$0x3] %v1317_v7  ;;  %1574 = vst [vmem:[%s3744_s2 + $0x136] sm:$0x3] %v1318_v8  ;;  %v1323_v19 = vadd.f32 %v1759_v16, %v299_v17 }
 0x292   :  { %1575 = vst [vmem:[%s3744_s2 + $0x138] sm:$0x3] %v1319_v9 }
 0x299   :  { %v300_v20 = vld [vmem:[%s3742_s0 + $0x142] sm:$0x3]  ;;  %v301_v22 = vld [vmem:[%s3742_s0 + $0x144] sm:$0x3] }
 0x29a   :  { %1576 = vst [vmem:[%s3744_s2 + $0x13a] sm:$0x3] %v1320_v13  ;;  %1577 = vst [vmem:[%s3744_s2 + $0x13c] sm:$0x3] %v1321_v14  ;;  %v1324_v23 = vadd.f32 %v1760_v18, %v300_v20  ;;  %v1325_v24 = vadd.f32 %v1761_v21, %v301_v22 }
 0x29b   :  { %1578 = vst [vmem:[%s3744_s2 + $0x13e] sm:$0x3] %v1322_v15 }
 0x2a2   :  { %v302_v26 = vld [vmem:[%s3742_s0 + $0x146] sm:$0x3] }
 0x2a3   :  { %1579 = vst [vmem:[%s3744_s2 + $0x140] sm:$0x3] %v1323_v19  ;;  %v1326_v28 = vadd.f32 %v1762_v25, %v302_v26 }
 0x2aa   :  { %v303_v29 = vld [vmem:[%s3742_s0 + $0x148] sm:$0x3]  ;;  %v304_v31 = vld [vmem:[%s3742_s0 + $0x14a] sm:$0x3] }
 0x2ab   :  { %1580 = vst [vmem:[%s3744_s2 + $0x142] sm:$0x3] %v1324_v23  ;;  %1581 = vst [vmem:[%s3744_s2 + $0x144] sm:$0x3] %v1325_v24  ;;  %v1327_v32 = vadd.f32 %v1763_v27, %v303_v29  ;;  %v1328_v33 = vadd.f32 %v1764_v30, %v304_v31 }
 0x2b2   :  { %v305_v35 = vld [vmem:[%s3742_s0 + $0x14c] sm:$0x3] }
 0x2b3   :  { %1582 = vst [vmem:[%s3744_s2 + $0x146] sm:$0x3] %v1326_v28  ;;  %v1329_v37 = vadd.f32 %v1765_v34, %v305_v35 }
 0x2ba   :  { %v306_v38 = vld [vmem:[%s3742_s0 + $0x14e] sm:$0x3]  ;;  %v307_v39 = vld [vmem:[%s3742_s0 + $0x150] sm:$0x3]  ;;  %v308_v40 = vld [vmem:[%s3742_s0 + $0x152] sm:$0x3] }
 0x2bb   :  { %1583 = vst [vmem:[%s3744_s2 + $0x148] sm:$0x3] %v1327_v32  ;;  %1584 = vst [vmem:[%s3744_s2 + $0x14a] sm:$0x3] %v1328_v33  ;;  %v1330_v41 = vadd.f32 %v1766_v36, %v306_v38  ;;  %v1331_v42 = vadd.f32 %v1759_v16, %v307_v39  ;;  %v1332_v43 = vadd.f32 %v1760_v18, %v308_v40  ;;  %v1775_v32 = vld [vmem:[%s3743_s1 + $0x60] ss:$0 sm:$0xff] }
 0x2c2   :  { %v309_v44 = vld [vmem:[%s3742_s0 + $0x154] sm:$0x3]  ;;  %v310_v45 = vld [vmem:[%s3742_s0 + $0x156] sm:$0x3]  ;;  %v311_v46 = vld [vmem:[%s3742_s0 + $0x158] sm:$0x3] }
 0x2c3   :  { %1585 = vst [vmem:[%s3744_s2 + $0x14c] sm:$0x3] %v1329_v37  ;;  %v1333_v47 = vadd.f32 %v1761_v21, %v309_v44  ;;  %v1334_v48 = vadd.f32 %v1762_v25, %v310_v45  ;;  %v1335_v49 = vadd.f32 %v1763_v27, %v311_v46  ;;  %v1777_v37 = vld [vmem:[%s3743_s1 + $0x62] ss:$0 sm:$0xff]  ;;  %v1780_v46 = vld [vmem:[%s3743_s1 + $0x65] ss:$0 sm:$0xff] }
 0x2ca   :  { %v312_v50 = vld [vmem:[%s3742_s0 + $0x15a] sm:$0x3]  ;;  %v313_v51 = vld [vmem:[%s3742_s0 + $0x15c] sm:$0x3]  ;;  %v314_v52 = vld [vmem:[%s3742_s0 + $0x15e] sm:$0x3] }
 0x2cb   :  { %1586 = vst [vmem:[%s3744_s2 + $0x14e] sm:$0x3] %v1330_v41  ;;  %1587 = vst [vmem:[%s3744_s2 + $0x150] sm:$0x3] %v1331_v42  ;;  %v1336_v53 = vadd.f32 %v1764_v30, %v312_v50  ;;  %v1337_v54 = vadd.f32 %v1765_v34, %v313_v51  ;;  %v1338_v55 = vadd.f32 %v1766_v36, %v314_v52  ;;  %v1776_v34 = vld [vmem:[%s3743_s1 + $0x61] ss:$0 sm:$0xff] }
 0x2cc   :  { %1588 = vst [vmem:[%s3744_s2 + $0x152] sm:$0x3] %v1332_v43  ;;  %v1778_v41 = vld [vmem:[%s3743_s1 + $0x63] ss:$0 sm:$0xff]  ;;  %v1779_v43 = vld [vmem:[%s3743_s1 + $0x64] ss:$0 sm:$0xff] }
 0x2cd   :  { %v1781_v50 = vld [vmem:[%s3743_s1 + $0x66] ss:$0 sm:$0xff]  ;;  %v1782_v52 = vld [vmem:[%s3743_s1 + $0x67] ss:$0 sm:$0xff] }
 0x2d3   :  { %v315_v57 = vld [vmem:[%s3742_s0 + $0x160] sm:$0x3] }
 0x2d4   :  { %1589 = vst [vmem:[%s3744_s2 + $0x154] sm:$0x3] %v1333_v47  ;;  %1590 = vst [vmem:[%s3744_s2 + $0x156] sm:$0x3] %v1334_v48  ;;  %v1339_v59 = vadd.f32 %v1767_v56, %v315_v57 }
 0x2d5   :  { %1591 = vst [vmem:[%s3744_s2 + $0x158] sm:$0x3] %v1335_v49 }
 0x2dc   :  { %v316_v60 = vld [vmem:[%s3742_s0 + $0x162] sm:$0x3]  ;;  %v317_v62 = vld [vmem:[%s3742_s0 + $0x164] sm:$0x3] }
 0x2dd   :  { %1592 = vst [vmem:[%s3744_s2 + $0x15a] sm:$0x3] %v1336_v53  ;;  %1593 = vst [vmem:[%s3744_s2 + $0x15c] sm:$0x3] %v1337_v54  ;;  %v1340_v63 = vadd.f32 %v1768_v58, %v316_v60  ;;  %v1341_v0 = vadd.f32 %v1769_v61, %v317_v62 }
 0x2de   :  { %1594 = vst [vmem:[%s3744_s2 + $0x15e] sm:$0x3] %v1338_v55 }
 0x2e5   :  { %v318_v2 = vld [vmem:[%s3742_s0 + $0x166] sm:$0x3] }
 0x2e6   :  { %1595 = vst [vmem:[%s3744_s2 + $0x160] sm:$0x3] %v1339_v59  ;;  %v1342_v4 = vadd.f32 %v1770_v1, %v318_v2 }
 0x2ed   :  { %v319_v5 = vld [vmem:[%s3742_s0 + $0x168] sm:$0x3]  ;;  %v320_v7 = vld [vmem:[%s3742_s0 + $0x16a] sm:$0x3] }
 0x2ee   :  { %1596 = vst [vmem:[%s3744_s2 + $0x162] sm:$0x3] %v1340_v63  ;;  %1597 = vst [vmem:[%s3744_s2 + $0x164] sm:$0x3] %v1341_v0  ;;  %v1343_v8 = vadd.f32 %v1771_v3, %v319_v5  ;;  %v1344_v9 = vadd.f32 %v1772_v6, %v320_v7 }
 0x2f5   :  { %v321_v11 = vld [vmem:[%s3742_s0 + $0x16c] sm:$0x3] }
 0x2f6   :  { %1598 = vst [vmem:[%s3744_s2 + $0x166] sm:$0x3] %v1342_v4  ;;  %v1345_v13 = vadd.f32 %v1773_v10, %v321_v11 }
 0x2fd   :  { %v322_v14 = vld [vmem:[%s3742_s0 + $0x16e] sm:$0x3]  ;;  %v323_v15 = vld [vmem:[%s3742_s0 + $0x170] sm:$0x3]  ;;  %v324_v16 = vld [vmem:[%s3742_s0 + $0x172] sm:$0x3] }
 0x2fe   :  { %1599 = vst [vmem:[%s3744_s2 + $0x168] sm:$0x3] %v1343_v8  ;;  %1600 = vst [vmem:[%s3744_s2 + $0x16a] sm:$0x3] %v1344_v9  ;;  %v1346_v17 = vadd.f32 %v1774_v12, %v322_v14  ;;  %v1347_v18 = vadd.f32 %v1767_v56, %v323_v15  ;;  %v1348_v19 = vadd.f32 %v1768_v58, %v324_v16  ;;  %v1783_v8 = vld [vmem:[%s3743_s1 + $0x68] ss:$0 sm:$0xff] }
 0x305   :  { %v325_v20 = vld [vmem:[%s3742_s0 + $0x174] sm:$0x3]  ;;  %v326_v21 = vld [vmem:[%s3742_s0 + $0x176] sm:$0x3]  ;;  %v327_v22 = vld [vmem:[%s3742_s0 + $0x178] sm:$0x3] }
 0x306   :  { %1601 = vst [vmem:[%s3744_s2 + $0x16c] sm:$0x3] %v1345_v13  ;;  %v1349_v23 = vadd.f32 %v1769_v61, %v325_v20  ;;  %v1350_v24 = vadd.f32 %v1770_v1, %v326_v21  ;;  %v1351_v25 = vadd.f32 %v1771_v3, %v327_v22  ;;  %v1785_v13 = vld [vmem:[%s3743_s1 + $0x6a] ss:$0 sm:$0xff]  ;;  %v1788_v22 = vld [vmem:[%s3743_s1 + $0x6d] ss:$0 sm:$0xff] }
 0x30d   :  { %v328_v26 = vld [vmem:[%s3742_s0 + $0x17a] sm:$0x3]  ;;  %v329_v27 = vld [vmem:[%s3742_s0 + $0x17c] sm:$0x3]  ;;  %v330_v28 = vld [vmem:[%s3742_s0 + $0x17e] sm:$0x3] }
 0x30e   :  { %1602 = vst [vmem:[%s3744_s2 + $0x16e] sm:$0x3] %v1346_v17  ;;  %1603 = vst [vmem:[%s3744_s2 + $0x170] sm:$0x3] %v1347_v18  ;;  %v1352_v29 = vadd.f32 %v1772_v6, %v328_v26  ;;  %v1353_v30 = vadd.f32 %v1773_v10, %v329_v27  ;;  %v1354_v31 = vadd.f32 %v1774_v12, %v330_v28  ;;  %v1784_v10 = vld [vmem:[%s3743_s1 + $0x69] ss:$0 sm:$0xff] }
 0x30f   :  { %1604 = vst [vmem:[%s3744_s2 + $0x172] sm:$0x3] %v1348_v19  ;;  %v1786_v17 = vld [vmem:[%s3743_s1 + $0x6b] ss:$0 sm:$0xff]  ;;  %v1787_v19 = vld [vmem:[%s3743_s1 + $0x6c] ss:$0 sm:$0xff] }
 0x310   :  { %v1789_v26 = vld [vmem:[%s3743_s1 + $0x6e] ss:$0 sm:$0xff]  ;;  %v1790_v28 = vld [vmem:[%s3743_s1 + $0x6f] ss:$0 sm:$0xff] }
 0x316   :  { %v331_v33 = vld [vmem:[%s3742_s0 + $0x180] sm:$0x3] }
 0x317   :  { %1605 = vst [vmem:[%s3744_s2 + $0x174] sm:$0x3] %v1349_v23  ;;  %1606 = vst [vmem:[%s3744_s2 + $0x176] sm:$0x3] %v1350_v24  ;;  %v1355_v35 = vadd.f32 %v1775_v32, %v331_v33 }
 0x318   :  { %1607 = vst [vmem:[%s3744_s2 + $0x178] sm:$0x3] %v1351_v25 }
 0x31f   :  { %v332_v36 = vld [vmem:[%s3742_s0 + $0x182] sm:$0x3]  ;;  %v333_v38 = vld [vmem:[%s3742_s0 + $0x184] sm:$0x3] }
 0x320   :  { %1608 = vst [vmem:[%s3744_s2 + $0x17a] sm:$0x3] %v1352_v29  ;;  %1609 = vst [vmem:[%s3744_s2 + $0x17c] sm:$0x3] %v1353_v30  ;;  %v1356_v39 = vadd.f32 %v1776_v34, %v332_v36  ;;  %v1357_v40 = vadd.f32 %v1777_v37, %v333_v38 }
 0x321   :  { %1610 = vst [vmem:[%s3744_s2 + $0x17e] sm:$0x3] %v1354_v31 }
 0x328   :  { %v334_v42 = vld [vmem:[%s3742_s0 + $0x186] sm:$0x3] }
 0x329   :  { %1611 = vst [vmem:[%s3744_s2 + $0x180] sm:$0x3] %v1355_v35  ;;  %v1358_v44 = vadd.f32 %v1778_v41, %v334_v42 }
 0x330   :  { %v335_v45 = vld [vmem:[%s3742_s0 + $0x188] sm:$0x3]  ;;  %v336_v47 = vld [vmem:[%s3742_s0 + $0x18a] sm:$0x3] }
 0x331   :  { %1612 = vst [vmem:[%s3744_s2 + $0x182] sm:$0x3] %v1356_v39  ;;  %1613 = vst [vmem:[%s3744_s2 + $0x184] sm:$0x3] %v1357_v40  ;;  %v1359_v48 = vadd.f32 %v1779_v43, %v335_v45  ;;  %v1360_v49 = vadd.f32 %v1780_v46, %v336_v47 }
 0x338   :  { %v337_v51 = vld [vmem:[%s3742_s0 + $0x18c] sm:$0x3] }
 0x339   :  { %1614 = vst [vmem:[%s3744_s2 + $0x186] sm:$0x3] %v1358_v44  ;;  %v1361_v53 = vadd.f32 %v1781_v50, %v337_v51 }
 0x340   :  { %v338_v54 = vld [vmem:[%s3742_s0 + $0x18e] sm:$0x3]  ;;  %v339_v55 = vld [vmem:[%s3742_s0 + $0x190] sm:$0x3]  ;;  %v340_v56 = vld [vmem:[%s3742_s0 + $0x192] sm:$0x3] }
 0x341   :  { %1615 = vst [vmem:[%s3744_s2 + $0x188] sm:$0x3] %v1359_v48  ;;  %1616 = vst [vmem:[%s3744_s2 + $0x18a] sm:$0x3] %v1360_v49  ;;  %v1362_v57 = vadd.f32 %v1782_v52, %v338_v54  ;;  %v1363_v58 = vadd.f32 %v1775_v32, %v339_v55  ;;  %v1364_v59 = vadd.f32 %v1776_v34, %v340_v56  ;;  %v1791_v48 = vld [vmem:[%s3743_s1 + $0x70] ss:$0 sm:$0xff] }
 0x348   :  { %v341_v60 = vld [vmem:[%s3742_s0 + $0x194] sm:$0x3]  ;;  %v342_v61 = vld [vmem:[%s3742_s0 + $0x196] sm:$0x3]  ;;  %v343_v62 = vld [vmem:[%s3742_s0 + $0x198] sm:$0x3] }
 0x349   :  { %1617 = vst [vmem:[%s3744_s2 + $0x18c] sm:$0x3] %v1361_v53  ;;  %v1365_v63 = vadd.f32 %v1777_v37, %v341_v60  ;;  %v1366_v0 = vadd.f32 %v1778_v41, %v342_v61  ;;  %v1367_v1 = vadd.f32 %v1779_v43, %v343_v62  ;;  %v1793_v53 = vld [vmem:[%s3743_s1 + $0x72] ss:$0 sm:$0xff]  ;;  %v1796_v62 = vld [vmem:[%s3743_s1 + $0x75] ss:$0 sm:$0xff] }
 0x350   :  { %v344_v2 = vld [vmem:[%s3742_s0 + $0x19a] sm:$0x3]  ;;  %v345_v3 = vld [vmem:[%s3742_s0 + $0x19c] sm:$0x3]  ;;  %v346_v4 = vld [vmem:[%s3742_s0 + $0x19e] sm:$0x3] }
 0x351   :  { %1618 = vst [vmem:[%s3744_s2 + $0x18e] sm:$0x3] %v1362_v57  ;;  %1619 = vst [vmem:[%s3744_s2 + $0x190] sm:$0x3] %v1363_v58  ;;  %v1368_v5 = vadd.f32 %v1780_v46, %v344_v2  ;;  %v1369_v6 = vadd.f32 %v1781_v50, %v345_v3  ;;  %v1370_v7 = vadd.f32 %v1782_v52, %v346_v4  ;;  %v1792_v50 = vld [vmem:[%s3743_s1 + $0x71] ss:$0 sm:$0xff] }
 0x352   :  { %1620 = vst [vmem:[%s3744_s2 + $0x192] sm:$0x3] %v1364_v59  ;;  %v1794_v57 = vld [vmem:[%s3743_s1 + $0x73] ss:$0 sm:$0xff]  ;;  %v1795_v59 = vld [vmem:[%s3743_s1 + $0x74] ss:$0 sm:$0xff] }
 0x353   :  { %v1797_v2 = vld [vmem:[%s3743_s1 + $0x76] ss:$0 sm:$0xff]  ;;  %v1798_v4 = vld [vmem:[%s3743_s1 + $0x77] ss:$0 sm:$0xff] }
 0x359   :  { %v347_v9 = vld [vmem:[%s3742_s0 + $0x1a0] sm:$0x3] }
 0x35a   :  { %1621 = vst [vmem:[%s3744_s2 + $0x194] sm:$0x3] %v1365_v63  ;;  %1622 = vst [vmem:[%s3744_s2 + $0x196] sm:$0x3] %v1366_v0  ;;  %v1371_v11 = vadd.f32 %v1783_v8, %v347_v9 }
 0x35b   :  { %1623 = vst [vmem:[%s3744_s2 + $0x198] sm:$0x3] %v1367_v1 }
 0x362   :  { %v348_v12 = vld [vmem:[%s3742_s0 + $0x1a2] sm:$0x3]  ;;  %v349_v14 = vld [vmem:[%s3742_s0 + $0x1a4] sm:$0x3] }
 0x363   :  { %1624 = vst [vmem:[%s3744_s2 + $0x19a] sm:$0x3] %v1368_v5  ;;  %1625 = vst [vmem:[%s3744_s2 + $0x19c] sm:$0x3] %v1369_v6  ;;  %v1372_v15 = vadd.f32 %v1784_v10, %v348_v12  ;;  %v1373_v16 = vadd.f32 %v1785_v13, %v349_v14 }
 0x364   :  { %1626 = vst [vmem:[%s3744_s2 + $0x19e] sm:$0x3] %v1370_v7 }
 0x36b   :  { %v350_v18 = vld [vmem:[%s3742_s0 + $0x1a6] sm:$0x3] }
 0x36c   :  { %1627 = vst [vmem:[%s3744_s2 + $0x1a0] sm:$0x3] %v1371_v11  ;;  %v1374_v20 = vadd.f32 %v1786_v17, %v350_v18 }
 0x373   :  { %v351_v21 = vld [vmem:[%s3742_s0 + $0x1a8] sm:$0x3]  ;;  %v352_v23 = vld [vmem:[%s3742_s0 + $0x1aa] sm:$0x3] }
 0x374   :  { %1628 = vst [vmem:[%s3744_s2 + $0x1a2] sm:$0x3] %v1372_v15  ;;  %1629 = vst [vmem:[%s3744_s2 + $0x1a4] sm:$0x3] %v1373_v16  ;;  %v1375_v24 = vadd.f32 %v1787_v19, %v351_v21  ;;  %v1376_v25 = vadd.f32 %v1788_v22, %v352_v23 }
 0x37b   :  { %v353_v27 = vld [vmem:[%s3742_s0 + $0x1ac] sm:$0x3] }
 0x37c   :  { %1630 = vst [vmem:[%s3744_s2 + $0x1a6] sm:$0x3] %v1374_v20  ;;  %v1377_v29 = vadd.f32 %v1789_v26, %v353_v27 }
 0x383   :  { %v354_v30 = vld [vmem:[%s3742_s0 + $0x1ae] sm:$0x3]  ;;  %v355_v31 = vld [vmem:[%s3742_s0 + $0x1b0] sm:$0x3]  ;;  %v356_v32 = vld [vmem:[%s3742_s0 + $0x1b2] sm:$0x3] }
 0x384   :  { %1631 = vst [vmem:[%s3744_s2 + $0x1a8] sm:$0x3] %v1375_v24  ;;  %1632 = vst [vmem:[%s3744_s2 + $0x1aa] sm:$0x3] %v1376_v25  ;;  %v1378_v33 = vadd.f32 %v1790_v28, %v354_v30  ;;  %v1379_v34 = vadd.f32 %v1783_v8, %v355_v31  ;;  %v1380_v35 = vadd.f32 %v1784_v10, %v356_v32  ;;  %v1799_v24 = vld [vmem:[%s3743_s1 + $0x78] ss:$0 sm:$0xff] }
 0x38b   :  { %v357_v36 = vld [vmem:[%s3742_s0 + $0x1b4] sm:$0x3]  ;;  %v358_v37 = vld [vmem:[%s3742_s0 + $0x1b6] sm:$0x3]  ;;  %v359_v38 = vld [vmem:[%s3742_s0 + $0x1b8] sm:$0x3] }
 0x38c   :  { %1633 = vst [vmem:[%s3744_s2 + $0x1ac] sm:$0x3] %v1377_v29  ;;  %v1381_v39 = vadd.f32 %v1785_v13, %v357_v36  ;;  %v1382_v40 = vadd.f32 %v1786_v17, %v358_v37  ;;  %v1383_v41 = vadd.f32 %v1787_v19, %v359_v38  ;;  %v1801_v29 = vld [vmem:[%s3743_s1 + $0x7a] ss:$0 sm:$0xff]  ;;  %v1804_v38 = vld [vmem:[%s3743_s1 + $0x7d] ss:$0 sm:$0xff] }
 0x393   :  { %v360_v42 = vld [vmem:[%s3742_s0 + $0x1ba] sm:$0x3]  ;;  %v361_v43 = vld [vmem:[%s3742_s0 + $0x1bc] sm:$0x3]  ;;  %v362_v44 = vld [vmem:[%s3742_s0 + $0x1be] sm:$0x3] }
 0x394   :  { %1634 = vst [vmem:[%s3744_s2 + $0x1ae] sm:$0x3] %v1378_v33  ;;  %1635 = vst [vmem:[%s3744_s2 + $0x1b0] sm:$0x3] %v1379_v34  ;;  %v1384_v45 = vadd.f32 %v1788_v22, %v360_v42  ;;  %v1385_v46 = vadd.f32 %v1789_v26, %v361_v43  ;;  %v1386_v47 = vadd.f32 %v1790_v28, %v362_v44  ;;  %v1800_v26 = vld [vmem:[%s3743_s1 + $0x79] ss:$0 sm:$0xff] }
 0x395   :  { %1636 = vst [vmem:[%s3744_s2 + $0x1b2] sm:$0x3] %v1380_v35  ;;  %v1802_v33 = vld [vmem:[%s3743_s1 + $0x7b] ss:$0 sm:$0xff]  ;;  %v1803_v35 = vld [vmem:[%s3743_s1 + $0x7c] ss:$0 sm:$0xff] }
 0x396   :  { %v1805_v42 = vld [vmem:[%s3743_s1 + $0x7e] ss:$0 sm:$0xff]  ;;  %v1806_v44 = vld [vmem:[%s3743_s1 + $0x7f] ss:$0 sm:$0xff] }
 0x39c   :  { %v363_v49 = vld [vmem:[%s3742_s0 + $0x1c0] sm:$0x3] }
 0x39d   :  { %1637 = vst [vmem:[%s3744_s2 + $0x1b4] sm:$0x3] %v1381_v39  ;;  %1638 = vst [vmem:[%s3744_s2 + $0x1b6] sm:$0x3] %v1382_v40  ;;  %v1387_v51 = vadd.f32 %v1791_v48, %v363_v49 }
 0x39e   :  { %1639 = vst [vmem:[%s3744_s2 + $0x1b8] sm:$0x3] %v1383_v41 }
 0x3a5   :  { %v364_v52 = vld [vmem:[%s3742_s0 + $0x1c2] sm:$0x3]  ;;  %v365_v54 = vld [vmem:[%s3742_s0 + $0x1c4] sm:$0x3] }
 0x3a6   :  { %1640 = vst [vmem:[%s3744_s2 + $0x1ba] sm:$0x3] %v1384_v45  ;;  %1641 = vst [vmem:[%s3744_s2 + $0x1bc] sm:$0x3] %v1385_v46  ;;  %v1388_v55 = vadd.f32 %v1792_v50, %v364_v52  ;;  %v1389_v56 = vadd.f32 %v1793_v53, %v365_v54 }
 0x3a7   :  { %1642 = vst [vmem:[%s3744_s2 + $0x1be] sm:$0x3] %v1386_v47 }
 0x3ae   :  { %v366_v58 = vld [vmem:[%s3742_s0 + $0x1c6] sm:$0x3] }
 0x3af   :  { %1643 = vst [vmem:[%s3744_s2 + $0x1c0] sm:$0x3] %v1387_v51  ;;  %v1390_v60 = vadd.f32 %v1794_v57, %v366_v58 }
 0x3b6   :  { %v367_v61 = vld [vmem:[%s3742_s0 + $0x1c8] sm:$0x3]  ;;  %v368_v63 = vld [vmem:[%s3742_s0 + $0x1ca] sm:$0x3] }
 0x3b7   :  { %1644 = vst [vmem:[%s3744_s2 + $0x1c2] sm:$0x3] %v1388_v55  ;;  %1645 = vst [vmem:[%s3744_s2 + $0x1c4] sm:$0x3] %v1389_v56  ;;  %v1391_v0 = vadd.f32 %v1795_v59, %v367_v61  ;;  %v1392_v1 = vadd.f32 %v1796_v62, %v368_v63 }
 0x3be   :  { %v369_v3 = vld [vmem:[%s3742_s0 + $0x1cc] sm:$0x3] }
 0x3bf   :  { %1646 = vst [vmem:[%s3744_s2 + $0x1c6] sm:$0x3] %v1390_v60  ;;  %v1393_v5 = vadd.f32 %v1797_v2, %v369_v3 }
 0x3c6   :  { %v370_v6 = vld [vmem:[%s3742_s0 + $0x1ce] sm:$0x3]  ;;  %v371_v7 = vld [vmem:[%s3742_s0 + $0x1d0] sm:$0x3]  ;;  %v372_v8 = vld [vmem:[%s3742_s0 + $0x1d2] sm:$0x3] }
 0x3c7   :  { %1647 = vst [vmem:[%s3744_s2 + $0x1c8] sm:$0x3] %v1391_v0  ;;  %1648 = vst [vmem:[%s3744_s2 + $0x1ca] sm:$0x3] %v1392_v1  ;;  %v1394_v9 = vadd.f32 %v1798_v4, %v370_v6  ;;  %v1395_v10 = vadd.f32 %v1791_v48, %v371_v7  ;;  %v1396_v11 = vadd.f32 %v1792_v50, %v372_v8 }
 0x3ce   :  { %v373_v12 = vld [vmem:[%s3742_s0 + $0x1d4] sm:$0x3]  ;;  %v374_v13 = vld [vmem:[%s3742_s0 + $0x1d6] sm:$0x3]  ;;  %v375_v14 = vld [vmem:[%s3742_s0 + $0x1d8] sm:$0x3] }
 0x3cf   :  { %1649 = vst [vmem:[%s3744_s2 + $0x1cc] sm:$0x3] %v1393_v5  ;;  %v1397_v15 = vadd.f32 %v1793_v53, %v373_v12  ;;  %v1398_v16 = vadd.f32 %v1794_v57, %v374_v13  ;;  %v1399_v17 = vadd.f32 %v1795_v59, %v375_v14 }
 0x3d6   :  { %v376_v18 = vld [vmem:[%s3742_s0 + $0x1da] sm:$0x3]  ;;  %v377_v19 = vld [vmem:[%s3742_s0 + $0x1dc] sm:$0x3]  ;;  %v378_v20 = vld [vmem:[%s3742_s0 + $0x1de] sm:$0x3] }
 0x3d7   :  { %1650 = vst [vmem:[%s3744_s2 + $0x1ce] sm:$0x3] %v1394_v9  ;;  %1651 = vst [vmem:[%s3744_s2 + $0x1d0] sm:$0x3] %v1395_v10  ;;  %v1400_v21 = vadd.f32 %v1796_v62, %v376_v18  ;;  %v1401_v22 = vadd.f32 %v1797_v2, %v377_v19  ;;  %v1402_v23 = vadd.f32 %v1798_v4, %v378_v20 }
 0x3d8   :  { %1652 = vst [vmem:[%s3744_s2 + $0x1d2] sm:$0x3] %v1396_v11 }
 0x3df   :  { %v379_v25 = vld [vmem:[%s3742_s0 + $0x1e0] sm:$0x3] }
 0x3e0   :  { %1653 = vst [vmem:[%s3744_s2 + $0x1d4] sm:$0x3] %v1397_v15  ;;  %1654 = vst [vmem:[%s3744_s2 + $0x1d6] sm:$0x3] %v1398_v16  ;;  %v1403_v27 = vadd.f32 %v1799_v24, %v379_v25 }
 0x3e1   :  { %1655 = vst [vmem:[%s3744_s2 + $0x1d8] sm:$0x3] %v1399_v17 }
 0x3e8   :  { %v380_v28 = vld [vmem:[%s3742_s0 + $0x1e2] sm:$0x3]  ;;  %v381_v30 = vld [vmem:[%s3742_s0 + $0x1e4] sm:$0x3] }
 0x3e9   :  { %1656 = vst [vmem:[%s3744_s2 + $0x1da] sm:$0x3] %v1400_v21  ;;  %1657 = vst [vmem:[%s3744_s2 + $0x1dc] sm:$0x3] %v1401_v22  ;;  %v1404_v31 = vadd.f32 %v1800_v26, %v380_v28  ;;  %v1405_v32 = vadd.f32 %v1801_v29, %v381_v30 }
 0x3ea   :  { %1658 = vst [vmem:[%s3744_s2 + $0x1de] sm:$0x3] %v1402_v23 }
 0x3f1   :  { %v382_v34 = vld [vmem:[%s3742_s0 + $0x1e6] sm:$0x3] }
 0x3f2   :  { %1659 = vst [vmem:[%s3744_s2 + $0x1e0] sm:$0x3] %v1403_v27  ;;  %v1406_v36 = vadd.f32 %v1802_v33, %v382_v34 }
 0x3f9   :  { %v383_v37 = vld [vmem:[%s3742_s0 + $0x1e8] sm:$0x3]  ;;  %v384_v39 = vld [vmem:[%s3742_s0 + $0x1ea] sm:$0x3] }
 0x3fa   :  { %1660 = vst [vmem:[%s3744_s2 + $0x1e2] sm:$0x3] %v1404_v31  ;;  %1661 = vst [vmem:[%s3744_s2 + $0x1e4] sm:$0x3] %v1405_v32  ;;  %v1407_v40 = vadd.f32 %v1803_v35, %v383_v37  ;;  %v1408_v41 = vadd.f32 %v1804_v38, %v384_v39 }
 0x401   :  { %v385_v43 = vld [vmem:[%s3742_s0 + $0x1ec] sm:$0x3] }
 0x402   :  { %1662 = vst [vmem:[%s3744_s2 + $0x1e6] sm:$0x3] %v1406_v36  ;;  %v1409_v45 = vadd.f32 %v1805_v42, %v385_v43 }
 0x409   :  { %v386_v46 = vld [vmem:[%s3742_s0 + $0x1ee] sm:$0x3]  ;;  %v387_v47 = vld [vmem:[%s3742_s0 + $0x1f0] sm:$0x3]  ;;  %v388_v48 = vld [vmem:[%s3742_s0 + $0x1f2] sm:$0x3] }
 0x40a   :  { %1663 = vst [vmem:[%s3744_s2 + $0x1e8] sm:$0x3] %v1407_v40  ;;  %1664 = vst [vmem:[%s3744_s2 + $0x1ea] sm:$0x3] %v1408_v41  ;;  %v1410_v49 = vadd.f32 %v1806_v44, %v386_v46  ;;  %v1411_v50 = vadd.f32 %v1799_v24, %v387_v47  ;;  %v1412_v51 = vadd.f32 %v1800_v26, %v388_v48 }
 0x411   :  { %v389_v52 = vld [vmem:[%s3742_s0 + $0x1f4] sm:$0x3]  ;;  %v390_v53 = vld [vmem:[%s3742_s0 + $0x1f6] sm:$0x3]  ;;  %v391_v54 = vld [vmem:[%s3742_s0 + $0x1f8] sm:$0x3] }
 0x412   :  { %1665 = vst [vmem:[%s3744_s2 + $0x1ec] sm:$0x3] %v1409_v45  ;;  %v1413_v55 = vadd.f32 %v1801_v29, %v389_v52  ;;  %v1414_v56 = vadd.f32 %v1802_v33, %v390_v53  ;;  %v1415_v57 = vadd.f32 %v1803_v35, %v391_v54 }
 0x419   :  { %v392_v58 = vld [vmem:[%s3742_s0 + $0x1fa] sm:$0x3]  ;;  %v393_v59 = vld [vmem:[%s3742_s0 + $0x1fc] sm:$0x3]  ;;  %v394_v60 = vld [vmem:[%s3742_s0 + $0x1fe] sm:$0x3] }
 0x41a   :  { %1666 = vst [vmem:[%s3744_s2 + $0x1ee] sm:$0x3] %v1410_v49  ;;  %1667 = vst [vmem:[%s3744_s2 + $0x1f0] sm:$0x3] %v1411_v50  ;;  %v1416_v61 = vadd.f32 %v1804_v38, %v392_v58  ;;  %v1417_v62 = vadd.f32 %v1805_v42, %v393_v59  ;;  %v1418_v63 = vadd.f32 %v1806_v44, %v394_v60 }
 0x41b   :  { %1668 = vst [vmem:[%s3744_s2 + $0x1f2] sm:$0x3] %v1412_v51  ;;  %1669 = vst [vmem:[%s3744_s2 + $0x1f4] sm:$0x3] %v1413_v55 }
 0x41c   :  { %1670 = vst [vmem:[%s3744_s2 + $0x1f6] sm:$0x3] %v1414_v56  ;;  %1671 = vst [vmem:[%s3744_s2 + $0x1f8] sm:$0x3] %v1415_v57 }
 0x41d   :  { %1672 = vst [vmem:[%s3744_s2 + $0x1fa] sm:$0x3] %v1416_v61  ;;  %1673 = vst [vmem:[%s3744_s2 + $0x1fc] sm:$0x3] %v1417_v62 }
 0x41e   :  { %1674 = vst [vmem:[%s3744_s2 + $0x1fe] sm:$0x3] %v1418_v63 }

</bundles_post_ra>
